<compile_context>
chip_gen: v7x
topology: tpu7x:2x2x1
jax: 0.10.0
libtpu: 0.0.40
codegen_flags: <defaults>
</compile_context>

<pallas_src>
import jax
import jax.numpy as jnp
from jax.experimental import pallas as pl
from jax.experimental.pallas import tpu as pltpu

NEG_SLOPE = 0.01               # F.leaky_relu default negative_slope
H1, H2 = 400, 300              # logical hidden sizes (PyTorch module)
H1P, H2P, QP = 512, 384, 128   # lane-padded hidden sizes / fused output width
TB_CAP = 512                   # max batch-tile rows


def _round_up(x, m):
    return ((x + m - 1) // m) * m


def _leaky_relu(x):
    # identical to where(x > 0, x, slope * x) for 0 < slope < 1; 2 VPU ops.
    return jnp.maximum(x, NEG_SLOPE * x)


def _choose_batch_tile(B):
    """Batch tile: multiple of 16 (bf16 sublane pairs), capped at TB_CAP,
    and >= 2 grid steps for large B so the 'parallel' axis can shard across
    both v7x TensorCores."""
    b16 = _round_up(B, 16)
    if b16 <= 256:
        return b16
    return min(TB_CAP, _round_up((b16 + 1) // 2, 16))


# --------------------------------- kernel -----------------------------------

def critic_kernel(xu_ref,
                  w1_ref, b1_ref,
                  w2_ref, b2_ref, w5_ref, b5_ref,
                  w36_ref, bq_ref,
                  q_ref):
    """One batch tile: both Q heads; layer-1 and layer-3 fully fused."""
    xu = xu_ref[...]                                            # (TB, KP) bf16

    # ---- fused layer 1 (both heads): single (TB, KP) x (KP, 2*H1P) matmul --
    h = jnp.dot(xu, w1_ref[...], preferred_element_type=jnp.float32) + b1_ref[...]
    h = _leaky_relu(h).astype(jnp.bfloat16)                     # (TB, 2*H1P)

    h1 = h[:, :H1P]          # head-1 activations (lane-aligned static slice)
    h2 = h[:, H1P:]          # head-2 activations

    # ---- layer 2, per head --------------------------------------------------
    g1 = jnp.dot(h1, w2_ref[...], preferred_element_type=jnp.float32) + b2_ref[...]
    g1 = _leaky_relu(g1).astype(jnp.bfloat16)                   # (TB, H2P)
    g2 = jnp.dot(h2, w5_ref[...], preferred_element_type=jnp.float32) + b5_ref[...]
    g2 = _leaky_relu(g2).astype(jnp.bfloat16)                   # (TB, H2P)

    # ---- fused layer 3: one matmul; q1 -> lane 0, q2 -> lane 1 --------------
    g = jnp.concatenate([g1, g2], axis=1)                       # (TB, 2*H2P), lane-aligned
    q_ref[...] = (jnp.dot(g, w36_ref[...], preferred_element_type=jnp.float32)
                  + bq_ref[...])


# --------------------------- parameter packing ------------------------------

def pack_critic_params(params, state_dim, action_dim):
    """Pad / fuse the PyTorch-layout params into lane-aligned bf16 operands.

    Padded weight rows/cols and bias entries are zero, so padded lanes stay
    numerically inert (leaky_relu(0) == 0).
    """
    d_in = state_dim + action_dim
    kp = max(128, _round_up(d_in, 128))     # lane-padded xu width

    # fused layer 1: (KP, 2*H1P); head-1 in cols [0,H1), head-2 in [H1P,H1P+H1)
    w1f = jnp.zeros((kp, 2 * H1P), jnp.float32)
    w1f = w1f.at[:d_in, :H1].set(params["w1"])
    w1f = w1f.at[:d_in, H1P:H1P + H1].set(params["w4"])
    b1f = jnp.zeros((1, 2 * H1P), jnp.float32)
    b1f = b1f.at[:, :H1].set(params["b1"])
    b1f = b1f.at[:, H1P:H1P + H1].set(params["b4"])

    def pad_mid(w, b):
        wp = jnp.zeros((H1P, H2P), jnp.float32).at[:H1, :H2].set(w)
        bp = jnp.zeros((1, H2P), jnp.float32).at[:, :H2].set(b)
        return wp, bp

    w2p, b2p = pad_mid(params["w2"], params["b2"])
    w5p, b5p = pad_mid(params["w5"], params["b5"])

    # fused layer 3: (2*H2P, QP); rows [0,H2) feed q1 (lane 0),
    # rows [H2P, H2P+H2) feed q2 (lane 1)
    w36 = jnp.zeros((2 * H2P, QP), jnp.float32)
    w36 = w36.at[:H2, 0:1].set(params["w3"])
    w36 = w36.at[H2P:H2P + H2, 1:2].set(params["w6"])
    bqf = jnp.zeros((1, QP), jnp.float32)
    bqf = bqf.at[:, 0:1].set(params["b3"]).at[:, 1:2].set(params["b6"])

    return dict(
        w1=w1f.astype(jnp.bfloat16), b1=b1f,
        w2=w2p.astype(jnp.bfloat16), b2=b2p,
        w5=w5p.astype(jnp.bfloat16), b5=b5p,
        w36=w36.astype(jnp.bfloat16), bq=bqf,
    )


# ------------------------------- wrapper -------------------------------------

def critic_forward(x, u, packed):
    """x: (B, state_dim), u: (B, action_dim). Returns (q1, q2), each (B, 1)."""
    B, state_dim = x.shape
    action_dim = u.shape[1]
    d_in = state_dim + action_dim
    kp = packed["w1"].shape[0]

    TB = _choose_batch_tile(B)
    Bp = _round_up(B, TB)
    grid = (Bp // TB,)

    # host-side concat + lane/batch pad: cheap (B x 12 array), gives a single
    # lane-dense input tile and unmasked stores (no partial blocks).
    xu = jnp.concatenate([x, u], axis=1).astype(jnp.bfloat16)
    xu = jnp.pad(xu, ((0, Bp - B), (0, kp - d_in)))

    def resident(arr):
        # full-array block, constant index -> stays in VMEM across grid steps
        return pl.BlockSpec(arr.shape, lambda i: (0, 0))

    p = packed
    operands = (xu,
                p["w1"], p["b1"],
                p["w2"], p["b2"], p["w5"], p["b5"],
                p["w36"], p["bq"])

    in_specs = [
        pl.BlockSpec((TB, kp), lambda i: (i, 0)),
        resident(p["w1"]), resident(p["b1"]),
        resident(p["w2"]), resident(p["b2"]),
        resident(p["w5"]), resident(p["b5"]),
        resident(p["w36"]), resident(p["bq"]),
    ]
    out_specs = pl.BlockSpec((TB, QP), lambda i: (i, 0))

    flops = 2 * Bp * (kp * 2 * H1P + 2 * H1P * H2P + 2 * H2P * QP)
    weight_bytes = sum(int(a.size) * a.dtype.itemsize for a in operands[1:])
    bytes_accessed = weight_bytes + int(xu.size) * 2 + Bp * QP * 4

    q = pl.pallas_call(
        critic_kernel,
        out_shape=jax.ShapeDtypeStruct((Bp, QP), jnp.float32),
        grid=grid,
        in_specs=in_specs,
        out_specs=out_specs,
        compiler_params=pltpu.CompilerParams(
            dimension_semantics=("parallel",),
            vmem_limit_bytes=32 * 1024 * 1024,
        ),
        cost_estimate=pl.CostEstimate(flops=flops, transcendentals=0,
                                      bytes_accessed=bytes_accessed),
    )(*operands)

    return q[:B, 0:1], q[:B, 1:2]


# ----------------------- deterministic parameter init -----------------------

def _xavier_normal(key, fan_in, fan_out):
    # torch.nn.init.xavier_normal_: N(0, sqrt(2 / (fan_in + fan_out)))
    std = (2.0 / (fan_in + fan_out)) ** 0.5
    # stored as (in, out): transpose of the PyTorch (out, in) weight
    return std * jax.random.normal(key, (fan_in, fan_out), dtype=jnp.float32)


def _default_bias(key, fan_in, fan_out):
    # PyTorch nn.Linear default bias init: U(-1/sqrt(fan_in), 1/sqrt(fan_in))
    bound = 1.0 / (fan_in ** 0.5)
    return jax.random.uniform(key, (1, fan_out), dtype=jnp.float32,
                              minval=-bound, maxval=bound)


def make_critic_params(key, state_dim, action_dim):
    d_in = state_dim + action_dim
    dims = [
        ("w1", "b1", d_in, H1),
        ("w2", "b2", H1, H2),
        ("w3", "b3", H2, 1),
        ("w4", "b4", d_in, H1),
        ("w5", "b5", H1, H2),
        ("w6", "b6", H2, 1),
    ]
    params = {}
    keys = jax.random.split(key, 2 * len(dims))
    for i, (wn, bn, fi, fo) in enumerate(dims):
        params[wn] = _xavier_normal(keys[2 * i], fi, fo)
        params[bn] = _default_bias(keys[2 * i + 1], fi, fo)
    return params


# ------------------------------- reference ----------------------------------

def critic_forward_ref(x, u, params):
    xu = jnp.concatenate([x, u], axis=1).astype(jnp.float32)

    def head(w1, b1, w2, b2, w3, b3):
        h = jax.nn.leaky_relu(xu @ w1 + b1, NEG_SLOPE)
        h = jax.nn.leaky_relu(h @ w2 + b2, NEG_SLOPE)
        return h @ w3 + b3

    q1 = head(params["w1"], params["b1"], params["w2"], params["b2"],
              params["w3"], params["b3"])
    q2 = head(params["w4"], params["b4"], params["w5"], params["b5"],
              params["w6"], params["b6"])
    return q1, q2


if __name__ == "__main__":
    state_dim, action_dim, batch = 8, 4, 8

    key = jax.random.PRNGKey(0)
    kx, ku, kp = jax.random.split(key, 3)
    x = jax.random.normal(kx, (batch, state_dim), dtype=jnp.float32)
    u = jax.random.normal(ku, (batch, action_dim), dtype=jnp.float32)
    params = make_critic_params(kp, state_dim, action_dim)
    packed = pack_critic_params(params, state_dim, action_dim)

    q1, q2 = critic_forward(x, u, packed)
    jax.block_until_ready((q1, q2))

    r1, r2 = critic_forward_ref(x, u, params)
    assert q1.shape == (batch, 1) and q2.shape == (batch, 1)
    # bf16 weights/activations with f32 accumulation -> looser tolerance vs f32 ref
    assert jnp.allclose(q1, r1, atol=2e-2, rtol=2e-2)
    assert jnp.allclose(q2, r2, atol=2e-2, rtol=2e-2)

    print("KERNEL_OK")
</pallas_src>

<mosaic_0001>
module attributes {stable_mosaic.version = 11 : i64} {
  func.func @critic_kernel(%arg0: i32, %arg1: memref<16x128xbf16, #tpu.memory_space<vmem>>, %arg2: memref<128x1024xbf16, #tpu.memory_space<vmem>>, %arg3: memref<1x1024xf32, #tpu.memory_space<vmem>>, %arg4: memref<512x384xbf16, #tpu.memory_space<vmem>>, %arg5: memref<1x384xf32, #tpu.memory_space<vmem>>, %arg6: memref<512x384xbf16, #tpu.memory_space<vmem>>, %arg7: memref<1x384xf32, #tpu.memory_space<vmem>>, %arg8: memref<768x128xbf16, #tpu.memory_space<vmem>>, %arg9: memref<1x128xf32, #tpu.memory_space<vmem>>, %arg10: memref<16x128xf32, #tpu.memory_space<vmem>>) attributes {dimension_semantics = [#tpu.dimension_semantics<parallel>], iteration_bounds = array<i64: 1>, scalar_prefetch = 0 : i64, scratch_operands = 0 : i64, tpu.core_type = #tpu.core_type<tc>, window_params = [{transform_indices = @transform_0, window_bounds = array<i64: 16, 128>}, {pipeline_mode = #tpu.pipeline_mode<synchronous>, transform_indices = @transform_1, window_bounds = array<i64: 128, 1024>}, {pipeline_mode = #tpu.pipeline_mode<synchronous>, transform_indices = @transform_2, window_bounds = array<i64: 1, 1024>}, {pipeline_mode = #tpu.pipeline_mode<synchronous>, transform_indices = @transform_3, window_bounds = array<i64: 512, 384>}, {pipeline_mode = #tpu.pipeline_mode<synchronous>, transform_indices = @transform_4, window_bounds = array<i64: 1, 384>}, {pipeline_mode = #tpu.pipeline_mode<synchronous>, transform_indices = @transform_5, window_bounds = array<i64: 512, 384>}, {pipeline_mode = #tpu.pipeline_mode<synchronous>, transform_indices = @transform_6, window_bounds = array<i64: 1, 384>}, {pipeline_mode = #tpu.pipeline_mode<synchronous>, transform_indices = @transform_7, window_bounds = array<i64: 768, 128>}, {pipeline_mode = #tpu.pipeline_mode<synchronous>, transform_indices = @transform_8, window_bounds = array<i64: 1, 128>}, {transform_indices = @transform_9, window_bounds = array<i64: 16, 128>}]} {
    %c0 = arith.constant 0 : index
    %c0_0 = arith.constant 0 : index
    %0 = vector.load %arg1[%c0, %c0_0] : memref<16x128xbf16, #tpu.memory_space<vmem>>, vector<16x128xbf16>
    %c0_1 = arith.constant 0 : index
    %c0_2 = arith.constant 0 : index
    %1 = vector.load %arg2[%c0_1, %c0_2] : memref<128x1024xbf16, #tpu.memory_space<vmem>>, vector<128x1024xbf16>
    %cst = arith.constant dense<0.000000e+00> : vector<16x1024xf32>
    %2 = tpu.matmul %0, %1, %cst {dimension_numbers = #tpu.dot_dimension_numbers<[1], [0], [0], [1], [0, 0, 1, 1], [], []>} : vector<16x128xbf16>, vector<128x1024xbf16>, vector<16x1024xf32> -> vector<16x1024xf32>
    %c0_3 = arith.constant 0 : index
    %c0_4 = arith.constant 0 : index
    %3 = vector.load %arg3[%c0_3, %c0_4] : memref<1x1024xf32, #tpu.memory_space<vmem>>, vector<1x1024xf32>
    %4 = vector.broadcast %3 : vector<1x1024xf32> to vector<16x1024xf32>
    %5 = arith.addf %2, %4 : vector<16x1024xf32>
    %cst_5 = arith.constant 0.00999999977 : f32
    %6 = vector.broadcast %cst_5 : f32 to vector<16x1024xf32>
    %7 = arith.mulf %6, %5 : vector<16x1024xf32>
    %8 = arith.maximumf %5, %7 : vector<16x1024xf32>
    %9 = arith.truncf %8 : vector<16x1024xf32> to vector<16x1024xbf16>
    %10 = vector.extract_strided_slice %9 {offsets = [0, 0], sizes = [16, 512], strides = [1, 1]} : vector<16x1024xbf16> to vector<16x512xbf16>
    %11 = vector.extract_strided_slice %9 {offsets = [0, 512], sizes = [16, 512], strides = [1, 1]} : vector<16x1024xbf16> to vector<16x512xbf16>
    %c0_6 = arith.constant 0 : index
    %c0_7 = arith.constant 0 : index
    %12 = vector.load %arg4[%c0_6, %c0_7] : memref<512x384xbf16, #tpu.memory_space<vmem>>, vector<512x384xbf16>
    %cst_8 = arith.constant dense<0.000000e+00> : vector<16x384xf32>
    %13 = tpu.matmul %10, %12, %cst_8 {dimension_numbers = #tpu.dot_dimension_numbers<[1], [0], [0], [1], [0, 0, 1, 1], [], []>} : vector<16x512xbf16>, vector<512x384xbf16>, vector<16x384xf32> -> vector<16x384xf32>
    %c0_9 = arith.constant 0 : index
    %c0_10 = arith.constant 0 : index
    %14 = vector.load %arg5[%c0_9, %c0_10] : memref<1x384xf32, #tpu.memory_space<vmem>>, vector<1x384xf32>
    %15 = vector.broadcast %14 : vector<1x384xf32> to vector<16x384xf32>
    %16 = arith.addf %13, %15 : vector<16x384xf32>
    %cst_11 = arith.constant 0.00999999977 : f32
    %17 = vector.broadcast %cst_11 : f32 to vector<16x384xf32>
    %18 = arith.mulf %17, %16 : vector<16x384xf32>
    %19 = arith.maximumf %16, %18 : vector<16x384xf32>
    %20 = arith.truncf %19 : vector<16x384xf32> to vector<16x384xbf16>
    %c0_12 = arith.constant 0 : index
    %c0_13 = arith.constant 0 : index
    %21 = vector.load %arg6[%c0_12, %c0_13] : memref<512x384xbf16, #tpu.memory_space<vmem>>, vector<512x384xbf16>
    %cst_14 = arith.constant dense<0.000000e+00> : vector<16x384xf32>
    %22 = tpu.matmul %11, %21, %cst_14 {dimension_numbers = #tpu.dot_dimension_numbers<[1], [0], [0], [1], [0, 0, 1, 1], [], []>} : vector<16x512xbf16>, vector<512x384xbf16>, vector<16x384xf32> -> vector<16x384xf32>
    %c0_15 = arith.constant 0 : index
    %c0_16 = arith.constant 0 : index
    %23 = vector.load %arg7[%c0_15, %c0_16] : memref<1x384xf32, #tpu.memory_space<vmem>>, vector<1x384xf32>
    %24 = vector.broadcast %23 : vector<1x384xf32> to vector<16x384xf32>
    %25 = arith.addf %22, %24 : vector<16x384xf32>
    %cst_17 = arith.constant 0.00999999977 : f32
    %26 = vector.broadcast %cst_17 : f32 to vector<16x384xf32>
    %27 = arith.mulf %26, %25 : vector<16x384xf32>
    %28 = arith.maximumf %25, %27 : vector<16x384xf32>
    %29 = arith.truncf %28 : vector<16x384xf32> to vector<16x384xbf16>
    %30 = tpu.concatenate %20, %29 in 1 : vector<16x384xbf16>, vector<16x384xbf16> -> vector<16x768xbf16>
    %c0_18 = arith.constant 0 : index
    %c0_19 = arith.constant 0 : index
    %31 = vector.load %arg8[%c0_18, %c0_19] : memref<768x128xbf16, #tpu.memory_space<vmem>>, vector<768x128xbf16>
    %cst_20 = arith.constant dense<0.000000e+00> : vector<16x128xf32>
    %32 = tpu.matmul %30, %31, %cst_20 {dimension_numbers = #tpu.dot_dimension_numbers<[1], [0], [0], [1], [0, 0, 1, 1], [], []>} : vector<16x768xbf16>, vector<768x128xbf16>, vector<16x128xf32> -> vector<16x128xf32>
    %c0_21 = arith.constant 0 : index
    %c0_22 = arith.constant 0 : index
    %33 = vector.load %arg9[%c0_21, %c0_22] : memref<1x128xf32, #tpu.memory_space<vmem>>, vector<1x128xf32>
    %34 = vector.broadcast %33 : vector<1x128xf32> to vector<16x128xf32>
    %35 = arith.addf %32, %34 : vector<16x128xf32>
    %c0_23 = arith.constant 0 : index
    %c0_24 = arith.constant 0 : index
    %36 = vector.load %arg10[%c0_23, %c0_24] : memref<16x128xf32, #tpu.memory_space<vmem>>, vector<16x128xf32>
    tpu.vector_store %arg10[%c0_23, %c0_24], %35 {strides = array<i32>} : memref<16x128xf32, #tpu.memory_space<vmem>>, vector<16x128xf32>,
    return
  }
  func.func @transform_0(%arg0: i32) -> (i32, i32) {
    %c0_i32 = arith.constant 0 : i32
    %c0_i32_0 = arith.constant 0 : i32
    return %arg0, %c0_i32 : i32, i32
  }
  func.func @transform_1(%arg0: i32) -> (i32, i32) {
    %c0_i32 = arith.constant 0 : i32
    %c0_i32_0 = arith.constant 0 : i32
    %c0_i32_1 = arith.constant 0 : i32
    return %c0_i32, %c0_i32_0 : i32, i32
  }
  func.func @transform_2(%arg0: i32) -> (i32, i32) {
    %c0_i32 = arith.constant 0 : i32
    %c0_i32_0 = arith.constant 0 : i32
    %c0_i32_1 = arith.constant 0 : i32
    return %c0_i32, %c0_i32_0 : i32, i32
  }
  func.func @transform_3(%arg0: i32) -> (i32, i32) {
    %c0_i32 = arith.constant 0 : i32
    %c0_i32_0 = arith.constant 0 : i32
    %c0_i32_1 = arith.constant 0 : i32
    return %c0_i32, %c0_i32_0 : i32, i32
  }
  func.func @transform_4(%arg0: i32) -> (i32, i32) {
    %c0_i32 = arith.constant 0 : i32
    %c0_i32_0 = arith.constant 0 : i32
    %c0_i32_1 = arith.constant 0 : i32
    return %c0_i32, %c0_i32_0 : i32, i32
  }
  func.func @transform_5(%arg0: i32) -> (i32, i32) {
    %c0_i32 = arith.constant 0 : i32
    %c0_i32_0 = arith.constant 0 : i32
    %c0_i32_1 = arith.constant 0 : i32
    return %c0_i32, %c0_i32_0 : i32, i32
  }
  func.func @transform_6(%arg0: i32) -> (i32, i32) {
    %c0_i32 = arith.constant 0 : i32
    %c0_i32_0 = arith.constant 0 : i32
    %c0_i32_1 = arith.constant 0 : i32
    return %c0_i32, %c0_i32_0 : i32, i32
  }
  func.func @transform_7(%arg0: i32) -> (i32, i32) {
    %c0_i32 = arith.constant 0 : i32
    %c0_i32_0 = arith.constant 0 : i32
    %c0_i32_1 = arith.constant 0 : i32
    return %c0_i32, %c0_i32_0 : i32, i32
  }
  func.func @transform_8(%arg0: i32) -> (i32, i32) {
    %c0_i32 = arith.constant 0 : i32
    %c0_i32_0 = arith.constant 0 : i32
    %c0_i32_1 = arith.constant 0 : i32
    return %c0_i32, %c0_i32_0 : i32, i32
  }
  func.func @transform_9(%arg0: i32) -> (i32, i32) {
    %c0_i32 = arith.constant 0 : i32
    %c0_i32_0 = arith.constant 0 : i32
    return %arg0, %c0_i32 : i32, i32
  }
}

</mosaic_0001>

<bundles_post_ra>
// kernel: tpu_custom_call.1
= control target key start
LH: loop header
LB: loop body
LE: loop exit
PB: predicated region body
PF: predicated region fallthrough
CT: control target
= control target key end

     0   :  { %14 = vsyncpa [#allocation3], 0  ;;  %s4176_s0 = inlined_call_operand.hbm [shape: bf16[16,128], index: 0, kind: input, shape index: {}]   ;;  %s4177_s1 = inlined_call_operand.hbm [shape: bf16[128,1024], index: 1, kind: input, shape index: {}]   ;;  %s4178_s2 = inlined_call_operand.hbm [shape: f32[1,1024], index: 2, kind: input, shape index: {}]   ;;  %s4179_s3 = inlined_call_operand.hbm [shape: bf16[512,384], index: 3, kind: input, shape index: {}]   ;;  %s4180_s4 = inlined_call_operand.vmem [shape: f32[1,384], index: 4, kind: input, shape index: {}]   ;;  %s4181_s5 = inlined_call_operand.hbm [shape: bf16[512,384], index: 5, kind: input, shape index: {}]   ;;  %s4182_s6 = inlined_call_operand.vmem [shape: f32[1,384], index: 6, kind: input, shape index: {}]   ;;  %s4183_s7 = inlined_call_operand.hbm [shape: bf16[768,128], index: 7, kind: input, shape index: {}]   ;;  %s4184_s8 = inlined_call_operand.vmem [shape: f32[1,128], index: 8, kind: input, shape index: {}]   ;;  %s4185_s9 = inlined_call_operand.hbm [shape: f32[16,128], index: 9, kind: output, shape index: {}]  }
   0x1   :  { %15 = vsyncpa [#allocation6], 0 }
   0x2   :  { %16 = vsyncpa [#allocation9], 0 }
   0x3   :  { %17 = vsyncpa [#allocation12], 0 }
   0x4   :  { %18 = vsyncpa [#allocation4], 0  ;;  %s3937_s30 = smov [#allocation5]   ;;  %s3773_s13 = scalar_lea.hbm %s4177_s1, 8192 }
   0x5   :  { %s36_s10 = sshll.u32 %s3937_s30, 4  ;;  %p3774_p0 = scmp.ne.s32.totalorder %s4177_s1, %s3773_s13  ;;  %s37_s10 = int_to_ptr.vmem [resolvable:$true] %s36_s10 }
   0x6   :  { %p3777_p1 = scmp.lt.u32.totalorder %s3773_s13, %s4177_s1 }
   0x8   :  { %p3779_p2 = pnand %p3777_p1, %p3774_p0 }
   0xa   :  { %3782 = shalt.err (!%p3779_p2)
}
   0xb   :  { %s3783_s18 = scalar_lea.vmem %s37_s10, 8192  ;;  %p3788_p4 = scmp.lt.s32.totalorder %s37_s10, %s37_s10 }
   0xc   :  { %p3784_p3 = scmp.ne.s32.totalorder %s37_s10, %s3783_s18  ;;  %p3789_p5 = scmp.lt.s32.totalorder %s3783_s18, %s3783_s18 }
   0xe   :  { %p3790_p6 = por %p3789_p5, %p3788_p4 }
  0x10   :  { %p3791_p7 = pnand %p3790_p6, %p3784_p3 }
  0x12   :  { %3794 = shalt.err (!%p3791_p7)
}
  0x13   :  { %s3938_s19 = smov 512   ;;  %s3939_s20 = smov 32  }
  0x14   :  { %42 = dma.hbm_to_vmem [thread:$0]  %s4177_s1, 8192, %s37_s10, [#allocation6], %s3938_s19, %s3938_s19, %s3939_s20  }
  0x15   :  { %s3940_s23 = smov [#allocation8]   ;;  %s3795_s27 = scalar_lea.hbm %s4179_s3, 12288 }
  0x16   :  { %s58_s24 = sshll.u32 %s3940_s23, 4  ;;  %p3796_p8 = scmp.ne.s32.totalorder %s4179_s3, %s3795_s27  ;;  %s59_s24 = int_to_ptr.vmem [resolvable:$true] %s58_s24 }
  0x17   :  { %p3799_p9 = scmp.lt.u32.totalorder %s3795_s27, %s4179_s3 }
  0x19   :  { %p3801_p10 = pnand %p3799_p9, %p3796_p8 }
  0x1b   :  { %3804 = shalt.err (!%p3801_p10)
}
  0x1c   :  { %s3805_s12 = scalar_lea.vmem %s59_s24, 12288  ;;  %p3810_p12 = scmp.lt.s32.totalorder %s59_s24, %s59_s24 }
  0x1d   :  { %p3806_p11 = scmp.ne.s32.totalorder %s59_s24, %s3805_s12  ;;  %p3811_p13 = scmp.lt.s32.totalorder %s3805_s12, %s3805_s12 }
  0x1f   :  { %p3812_p0 = por %p3811_p13, %p3810_p12 }
  0x21   :  { %p3813_p1 = pnand %p3812_p0, %p3806_p11 }
  0x23   :  { %3816 = shalt.err (!%p3813_p1)
}
  0x24   :  { %s3941_s1 = smov 192   ;;  %s3942_s10 = smov 12  }
  0x25   :  { %64 = dma.hbm_to_vmem [thread:$0]  %s4179_s3, 12288, %s59_s24, [#allocation9], %s3941_s1, %s3941_s1, %s3942_s10  }
  0x26   :  { %s3943_s15 = smov [#allocation2]   ;;  %s3817_s19 = scalar_lea.hbm %s4176_s0, 128 }
  0x27   :  { %s24_s16 = sshll.u32 %s3943_s15, 4  ;;  %p3818_p2 = scmp.ne.s32.totalorder %s4176_s0, %s3817_s19  ;;  %s25_s16 = int_to_ptr.vmem [resolvable:$true] %s24_s16 }
  0x28   :  { %p3821_p3 = scmp.lt.u32.totalorder %s3817_s19, %s4176_s0 }
  0x2a   :  { %p3823_p4 = pnand %p3821_p3, %p3818_p2 }
  0x2c   :  { %3826 = shalt.err (!%p3823_p4)
}
  0x2d   :  { %s3827_s25 = scalar_lea.vmem %s25_s16, 128  ;;  %p3832_p6 = scmp.lt.s32.totalorder %s25_s16, %s25_s16 }
  0x2e   :  { %p3828_p5 = scmp.ne.s32.totalorder %s25_s16, %s3827_s25  ;;  %p3833_p7 = scmp.lt.s32.totalorder %s3827_s25, %s3827_s25 }
  0x30   :  { %p3834_p8 = por %p3833_p7, %p3832_p6 }
  0x32   :  { %p3835_p9 = pnand %p3834_p8, %p3828_p5 }
  0x34   :  { %3838 = shalt.err (!%p3835_p9)
}
  0x35   :  { %s3944_s3 = smov 64   ;;  %s3945_s24 = smov 4  }
  0x36   :  { %30 = dma.hbm_to_vmem [thread:$0]  %s4176_s0, 128, %s25_s16, [#allocation3], %s3944_s3, %s3944_s3, %s3945_s24  }
  0x37   :  { %s3946_s28 = smov [#allocation7]   ;;  %s3947_s30 = smov [#allocation10]  }
  0x38   :  { %s49_s29 = sshll.u32 %s3946_s28, 4  ;;  %s72_s11 = sshll.u32 %s3947_s30, 4  ;;  %s50_s29 = int_to_ptr.vmem [resolvable:$true] %s49_s29  ;;  %s73_s11 = int_to_ptr.vmem [resolvable:$true] %s72_s11 }
  0x39   :  { %s3839_s14 = scalar_lea.hbm %s4178_s2, 128 }
  0x3a   :  { %p3840_p10 = scmp.ne.s32.totalorder %s4178_s2, %s3839_s14  ;;  %p3843_p11 = scmp.lt.u32.totalorder %s3839_s14, %s4178_s2 }
  0x3c   :  { %p3845_p12 = pnand %p3843_p11, %p3840_p10 }
  0x3e   :  { %3848 = shalt.err (!%p3845_p12)
}
  0x3f   :  { %s3849_s0 = scalar_lea.vmem %s50_s29, 128  ;;  %p3854_p0 = scmp.lt.s32.totalorder %s50_s29, %s50_s29 }
  0x40   :  { %p3850_p13 = scmp.ne.s32.totalorder %s50_s29, %s3849_s0  ;;  %p3855_p1 = scmp.lt.s32.totalorder %s3849_s0, %s3849_s0 }
  0x42   :  { %p3856_p2 = por %p3855_p1, %p3854_p0 }
  0x44   :  { %p3857_p3 = pnand %p3856_p2, %p3850_p13 }
  0x46   :  { %3860 = shalt.err (!%p3857_p3)
}
  0x47   :  { %52 = dma.hbm_to_vmem [thread:$0]  %s4178_s2, 128, %s50_s29, [#allocation6]  }
  0x48   :  { %s3861_s23 = scalar_lea.hbm %s4181_s5, 12288 }
  0x49   :  { %p3862_p4 = scmp.ne.s32.totalorder %s4181_s5, %s3861_s23  ;;  %p3865_p5 = scmp.lt.u32.totalorder %s3861_s23, %s4181_s5 }
  0x4b   :  { %p3867_p6 = pnand %p3865_p5, %p3862_p4 }
  0x4d   :  { %3870 = shalt.err (!%p3867_p6)
}
  0x4e   :  { %s3871_s30 = scalar_lea.vmem %s73_s11, 12288  ;;  %p3876_p8 = scmp.lt.s32.totalorder %s73_s11, %s73_s11 }
  0x4f   :  { %p3872_p7 = scmp.ne.s32.totalorder %s73_s11, %s3871_s30  ;;  %p3877_p9 = scmp.lt.s32.totalorder %s3871_s30, %s3871_s30 }
  0x51   :  { %p3878_p10 = por %p3877_p9, %p3876_p8 }
  0x53   :  { %p3879_p11 = pnand %p3878_p10, %p3872_p7 }
  0x55   :  { %3882 = shalt.err (!%p3879_p11)
}
  0x56   :  { %78 = dma.hbm_to_vmem [thread:$0]  %s4181_s5, 12288, %s73_s11, [#allocation9], %s3941_s1, %s3941_s1, %s3942_s10  }
  0x57   :  { %s3948_s12 = smov [#allocation11]   ;;  %s3883_s17 = scalar_lea.hbm %s4183_s7, 6144 }
  0x58   :  { %s86_s13 = sshll.u32 %s3948_s12, 4  ;;  %p3884_p12 = scmp.ne.s32.totalorder %s4183_s7, %s3883_s17  ;;  %s87_s13 = int_to_ptr.vmem [resolvable:$true] %s86_s13 }
  0x59   :  { %p3887_p13 = scmp.lt.u32.totalorder %s3883_s17, %s4183_s7 }
  0x5b   :  { %p3889_p0 = pnand %p3887_p13, %p3884_p12 }
  0x5d   :  { %3892 = shalt.err (!%p3889_p0)
}
  0x5e   :  { %s3893_s20 = scalar_lea.vmem %s87_s13, 6144  ;;  %p3898_p2 = scmp.lt.s32.totalorder %s87_s13, %s87_s13 }
  0x5f   :  { %p3894_p1 = scmp.ne.s32.totalorder %s87_s13, %s3893_s20  ;;  %p3899_p3 = scmp.lt.s32.totalorder %s3893_s20, %s3893_s20 }
  0x61   :  { %p3900_p4 = por %p3899_p3, %p3898_p2 }
  0x63   :  { %p3901_p5 = pnand %p3900_p4, %p3894_p1 }
  0x65   :  { %3904 = shalt.err (!%p3901_p5)
}
  0x66   :  { %92 = dma.hbm_to_vmem [thread:$0]  %s4183_s7, 6144, %s87_s13, [#allocation12], %s3944_s3, %s3944_s3, %s3945_s24  }
  0x67   :  { %3927 = dma.done.wait [#allocation3], 128  }
  0x68   :  { %3928 = vsyncadd [#allocation3], 4294967168 }
  0x69   :  { %3929 = dma.done.wait [#allocation6], 8320  }
  0x6a   :  { %3930 = vsyncadd [#allocation6], 4294958976 }
  0x6b   :  { %3931 = dma.done.wait [#allocation9], 24576  }
  0x6c   :  { %3932 = vsyncadd [#allocation9], 4294942720 }
  0x6d   :  { %3933 = dma.done.wait [#allocation12], 6144  }
  0x6e   :  { %3934 = vsyncadd [#allocation12], 4294961152  ;;  %v3949_v0 = vmov 0   ;;  %v116_v1 = vld [vmem:[#allocation5] sm:$0xff]  ;;  %v117_v11 = vld [vmem:[#allocation5 + $0x8] sm:$0xff]  ;;  %s3950_s11 = smov [#allocation13]  }
  0x6f   :  { %580 = vmatprep.mubr.bf16.mxu0 %v3949_v0  ;;  %623 = vmatprep.mubr.bf16.mxu1 %v3949_v0  ;;  %v120_v2 = vld [vmem:[#allocation5 + $0x20] sm:$0xff]  ;;  %v121_v15 = vld [vmem:[#allocation5 + $0x28] sm:$0xff]  ;;  %v118_v58 = vld [vmem:[#allocation5 + $0x10] sm:$0xff]  ;;  %s2961_s21 = sshll.u32 %s3950_s11, 4  ;;  %s2962_s21 = int_to_ptr.vmem [resolvable:$true] %s2961_s21 }
  0x70   :  { %v124_v3 = vld [vmem:[#allocation5 + $0x40] sm:$0xff]  ;;  %v2978_v4 = vcombine.high %v116_v1, %v120_v2  ;;  %v2977_v5 = vcombine.low %v116_v1, %v120_v2  ;;  %v2980_v16 = vcombine.high %v117_v11, %v121_v15  ;;  %v2979_v17 = vcombine.low %v117_v11, %v121_v15  ;;  %v125_v18 = vld [vmem:[#allocation5 + $0x48] sm:$0xff]  ;;  %v122_v60 = vld [vmem:[#allocation5 + $0x30] sm:$0xff]  ;;  %p3910_p7 = scmp.lt.s32.totalorder %s2962_s21, %s2962_s21 }
  0x71   :  { %v128_v6 = vld [vmem:[#allocation5 + $0x60] sm:$0xff]  ;;  %v129_v19 = vld [vmem:[#allocation5 + $0x68] sm:$0xff]  ;;  %v4089_v1 = vld [vmem:[#allocation2] sm:$0xff]  }
  0x72   :  { %v2986_v7 = vcombine.high %v124_v3, %v128_v6  ;;  %v132_v8 = vld [vmem:[#allocation5 + $0x80] sm:$0xff]  ;;  %548 = vmatprep.subr.bf16.mxu0 %v2978_v4  ;;  %v2985_v10 = vcombine.low %v124_v3, %v128_v6  ;;  %v2988_v20 = vcombine.high %v125_v18, %v129_v19  ;;  %v133_v21 = vld [vmem:[#allocation5 + $0x88] sm:$0xff]  ;;  %591 = vmatprep.subr.bf16.mxu1 %v2980_v16  ;;  %v126_v4 = vld [vmem:[#allocation5 + $0x50] sm:$0xff] }
  0x73   :  { %v136_v9 = vld [vmem:[#allocation5 + $0xa0] sm:$0xff]  ;;  %549 = vmatpush1.bf16.msra.mxu0 %v2977_v5  ;;  %v137_v23 = vld [vmem:[#allocation5 + $0xa8] sm:$0xff]  ;;  %592 = vmatpush1.bf16.msra.mxu1 %v2979_v17  ;;  %v2987_v25 = vcombine.low %v125_v18, %v129_v19  ;;  %v2982_v3 = vcombine.high %v118_v58, %v122_v60  ;;  %v130_v6 = vld [vmem:[#allocation5 + $0x70] sm:$0xff] }
  0x74   :  { %550 = vmatprep.subr.bf16.mxu0 %v2986_v7  ;;  %v2994_v12 = vcombine.high %v132_v8, %v136_v9  ;;  %v140_v13 = vld [vmem:[#allocation5 + $0xc0] sm:$0xff]  ;;  %v2993_v22 = vcombine.low %v132_v8, %v136_v9  ;;  %593 = vmatprep.subr.bf16.mxu1 %v2988_v20  ;;  %v2996_v28 = vcombine.high %v133_v21, %v137_v23  ;;  %v141_v29 = vld [vmem:[#allocation5 + $0xc8] sm:$0xff]  ;;  %v119_v7 = vld [vmem:[#allocation5 + $0x18] sm:$0xff] }
  0x75   :  { %v144_v14 = vld [vmem:[#allocation5 + $0xe0] sm:$0xff]  ;;  %v145_v30 = vld [vmem:[#allocation5 + $0xe8] sm:$0xff]  ;;  %v2995_v33 = vcombine.low %v133_v21, %v137_v23  ;;  %v123_v8 = vld [vmem:[#allocation5 + $0x38] sm:$0xff]  ;;  %v2981_v9 = vcombine.low %v118_v58, %v122_v60  ;;  %v2989_v17 = vcombine.low %v126_v4, %v130_v6 }
  0x76   :  { %v3002_v24 = vcombine.high %v140_v13, %v144_v14  ;;  %v148_v26 = vld [vmem:[#allocation5 + $0x100] sm:$0xff]  ;;  %v3001_v31 = vcombine.low %v140_v13, %v144_v14  ;;  %v3004_v36 = vcombine.high %v141_v29, %v145_v30  ;;  %v149_v37 = vld [vmem:[#allocation5 + $0x108] sm:$0xff]  ;;  %v3003_v41 = vcombine.low %v141_v29, %v145_v30  ;;  %v138_v13 = vld [vmem:[#allocation5 + $0xb0] sm:$0xff] }
  0x77   :  { %551 = vmatpush1.bf16.msra.mxu0 %v2985_v10  ;;  %v152_v27 = vld [vmem:[#allocation5 + $0x120] sm:$0xff]  ;;  %594 = vmatpush1.bf16.msra.mxu1 %v2987_v25  ;;  %v153_v38 = vld [vmem:[#allocation5 + $0x128] sm:$0xff]  ;;  %v134_v10 = vld [vmem:[#allocation5 + $0x90] sm:$0xff]  ;;  %v2984_v14 = vcombine.high %v119_v7, %v123_v8  ;;  %v2983_v21 = vcombine.low %v119_v7, %v123_v8 }
  0x78   :  { %552 = vmatprep.subr.bf16.mxu0 %v2994_v12  ;;  %v3010_v32 = vcombine.high %v148_v26, %v152_v27  ;;  %v156_v34 = vld [vmem:[#allocation5 + $0x140] sm:$0xff]  ;;  %595 = vmatprep.subr.bf16.mxu1 %v2996_v28  ;;  %v3009_v39 = vcombine.low %v148_v26, %v152_v27  ;;  %v3012_v44 = vcombine.high %v149_v37, %v153_v38  ;;  %v157_v45 = vld [vmem:[#allocation5 + $0x148] sm:$0xff]  ;;  %v127_v15 = vld [vmem:[#allocation5 + $0x58] sm:$0xff] }
  0x79   :  { %v160_v35 = vld [vmem:[#allocation5 + $0x160] sm:$0xff]  ;;  %v161_v46 = vld [vmem:[#allocation5 + $0x168] sm:$0xff]  ;;  %v3011_v50 = vcombine.low %v149_v37, %v153_v38  ;;  %v2990_v12 = vcombine.high %v126_v4, %v130_v6  ;;  %v131_v16 = vld [vmem:[#allocation5 + $0x78] sm:$0xff]  ;;  %v2998_v18 = vcombine.high %v134_v10, %v138_v13  ;;  %v2997_v25 = vcombine.low %v134_v10, %v138_v13 }
  0x7a   :  { %v3018_v40 = vcombine.high %v156_v34, %v160_v35  ;;  %v164_v42 = vld [vmem:[#allocation5 + $0x180] sm:$0xff]  ;;  %v3017_v47 = vcombine.low %v156_v34, %v160_v35  ;;  %v3020_v52 = vcombine.high %v157_v45, %v161_v46  ;;  %v165_v53 = vld [vmem:[#allocation5 + $0x188] sm:$0xff]  ;;  %v3019_v57 = vcombine.low %v157_v45, %v161_v46  ;;  %v142_v19 = vld [vmem:[#allocation5 + $0xd0] sm:$0xff] }
  0x7b   :  { %553 = vmatpush1.bf16.msra.mxu0 %v2993_v22  ;;  %596 = vmatpush1.bf16.msra.mxu1 %v2995_v33  ;;  %v168_v43 = vld [vmem:[#allocation5 + $0x1a0] sm:$0xff]  ;;  %v169_v54 = vld [vmem:[#allocation5 + $0x1a8] sm:$0xff]  ;;  %v146_v20 = vld [vmem:[#allocation5 + $0xf0] sm:$0xff]  ;;  %v2992_v22 = vcombine.high %v127_v15, %v131_v16  ;;  %v2991_v29 = vcombine.low %v127_v15, %v131_v16 }
  0x7c   :  { %554 = vmatprep.subr.bf16.mxu0 %v3002_v24  ;;  %597 = vmatprep.subr.bf16.mxu1 %v3004_v36  ;;  %v3026_v48 = vcombine.high %v164_v42, %v168_v43  ;;  %v172_v49 = vld [vmem:[#allocation5 + $0x1c0] sm:$0xff]  ;;  %v3025_v55 = vcombine.low %v164_v42, %v168_v43  ;;  %v3028_v59 = vcombine.high %v165_v53, %v169_v54  ;;  %v173_v61 = vld [vmem:[#allocation5 + $0x1c8] sm:$0xff]  ;;  %v135_v23 = vld [vmem:[#allocation5 + $0x98] sm:$0xff] }
  0x7d   :  { %v176_v51 = vld [vmem:[#allocation5 + $0x1e0] sm:$0xff]  ;;  %v177_v62 = vld [vmem:[#allocation5 + $0x1e8] sm:$0xff]  ;;  %v3027_v2 = vcombine.low %v165_v53, %v169_v54  ;;  %v139_v24 = vld [vmem:[#allocation5 + $0xb8] sm:$0xff]  ;;  %v3006_v27 = vcombine.high %v142_v19, %v146_v20  ;;  %v3005_v33 = vcombine.low %v142_v19, %v146_v20 }
  0x7e   :  { %v3034_v56 = vcombine.high %v172_v49, %v176_v51  ;;  %v3033_v63 = vcombine.low %v172_v49, %v176_v51  ;;  %v3036_v5 = vcombine.high %v173_v61, %v177_v62  ;;  %v3035_v11 = vcombine.low %v173_v61, %v177_v62  ;;  %v150_v26 = vld [vmem:[#allocation5 + $0x110] sm:$0xff]  ;;  %v159_v45 = vld [vmem:[#allocation5 + $0x158] sm:$0xff]  ;;  %v3472_v8 = vld [vmem:[#allocation8 + $0x18] ss:$12 sps:$4 sm:$0xff]  }
  0x7f   :  { %555 = vmatpush1.bf16.msra.mxu0 %v3001_v31  ;;  %598 = vmatpush1.bf16.msra.mxu1 %v3003_v41  ;;  %v154_v28 = vld [vmem:[#allocation5 + $0x130] sm:$0xff]  ;;  %v3000_v30 = vcombine.high %v135_v23, %v139_v24  ;;  %v143_v31 = vld [vmem:[#allocation5 + $0xd8] sm:$0xff]  ;;  %v2999_v36 = vcombine.low %v135_v23, %v139_v24  ;;  %v3506_v15 = vld [vmem:[#allocation8 + $0xf8] ss:$12 sps:$4 sm:$0xff]  }
  0x80   :  { %556 = vmatprep.subr.bf16.mxu0 %v3010_v32  ;;  %599 = vmatprep.subr.bf16.mxu1 %v3012_v44  ;;  %v147_v32 = vld [vmem:[#allocation5 + $0xf8] sm:$0xff]  ;;  %v3014_v34 = vcombine.high %v150_v26, %v154_v28  ;;  %v158_v35 = vld [vmem:[#allocation5 + $0x150] sm:$0xff]  ;;  %v3013_v41 = vcombine.low %v150_v26, %v154_v28 }
  0x81   :  { %v162_v37 = vld [vmem:[#allocation5 + $0x170] sm:$0xff]  ;;  %v3008_v38 = vcombine.high %v143_v31, %v147_v32  ;;  %v163_v46 = vld [vmem:[#allocation5 + $0x178] sm:$0xff] }
  0x82   :  { %v166_v42 = vld [vmem:[#allocation5 + $0x190] sm:$0xff]  ;;  %v3022_v44 = vcombine.high %v158_v35, %v162_v37  ;;  %v167_v53 = vld [vmem:[#allocation5 + $0x198] sm:$0xff]  ;;  %v3023_v58 = vcombine.low %v159_v45, %v163_v46 }
  0x83   :  { %557 = vmatpush1.bf16.msra.mxu0 %v3009_v39  ;;  %600 = vmatpush1.bf16.msra.mxu1 %v3011_v50  ;;  %v151_v39 = vld [vmem:[#allocation5 + $0x118] sm:$0xff]  ;;  %v170_v43 = vld [vmem:[#allocation5 + $0x1b0] sm:$0xff] }
  0x84   :  { %558 = vmatprep.subr.bf16.mxu0 %v3018_v40  ;;  %601 = vmatprep.subr.bf16.mxu1 %v3020_v52  ;;  %v155_v40 = vld [vmem:[#allocation5 + $0x138] sm:$0xff]  ;;  %v174_v49 = vld [vmem:[#allocation5 + $0x1d0] sm:$0xff]  ;;  %v3030_v51 = vcombine.high %v166_v42, %v170_v43 }
  0x85   :  { %v178_v50 = vld [vmem:[#allocation5 + $0x1f0] sm:$0xff]  ;;  %v3015_v52 = vcombine.low %v151_v39, %v155_v40  ;;  %v171_v54 = vld [vmem:[#allocation5 + $0x1b8] sm:$0xff] }
  0x86   :  { %v179_v60 = vld [vmem:[#allocation5 + $0x1f8] sm:$0xff]  ;;  %v3032_v61 = vcombine.high %v167_v53, %v171_v54  ;;  %v3469_v4 = vld [vmem:[#allocation8] ss:$12 sps:$4 sm:$0xff]  }
  0x87   :  { %559 = vmatpush1.bf16.msra.mxu0 %v3017_v47  ;;  %602 = vmatpush1.bf16.msra.mxu1 %v3019_v57  ;;  %v3016_v47 = vcombine.high %v151_v39, %v155_v40  ;;  %v3038_v57 = vcombine.high %v174_v49, %v178_v50  ;;  %v3471_v62 = vld [vmem:[#allocation8 + $0x4] ss:$12 sps:$4 sm:$0xff]   ;;  %v3496_v6 = vld [vmem:[#allocation8 + $0xc8] ss:$12 sps:$4 sm:$0xff]   ;;  %v3480_v13 = vld [vmem:[#allocation8 + $0x4c] ss:$12 sps:$4 sm:$0xff]  }
  0x88   :  { %560 = vmatprep.subr.bf16.mxu0 %v3026_v48  ;;  %603 = vmatprep.subr.bf16.mxu1 %v3028_v59  ;;  %v3021_v48 = vcombine.low %v158_v35, %v162_v37  ;;  %v175_v59 = vld [vmem:[#allocation5 + $0x1d8] sm:$0xff]  ;;  %v3481_v20 = vld [vmem:[#allocation8 + $0x60] ss:$12 sps:$4 sm:$0xff]   ;;  %v3520_v39 = vld [vmem:[#allocation8 + $0x13c] ss:$12 sps:$4 sm:$0xff]  }
  0x89   :  { %v3039_v7 = vcombine.low %v175_v59, %v179_v60  ;;  %v3497_v10 = vld [vmem:[#allocation8 + $0x8] ss:$12 sps:$4 sm:$0xff]   ;;  %v3511_v19 = vld [vmem:[#allocation8 + $0x110] ss:$12 sps:$4 sm:$0xff]   ;;  %v3510_v35 = vld [vmem:[#allocation8 + $0x10c] ss:$12 sps:$4 sm:$0xff]  }
  0x8a   :  { %v3478_v16 = vld [vmem:[#allocation8 + $0x48] ss:$12 sps:$4 sm:$0xff]   ;;  %v3487_v26 = vld [vmem:[#allocation8 + $0x90] ss:$12 sps:$4 sm:$0xff]   ;;  %v3521_v40 = vld [vmem:[#allocation8 + $0x140] ss:$12 sps:$4 sm:$0xff]  }
  0x8b   :  { %561 = vmatpush1.bf16.msra.mxu0 %v3025_v55  ;;  %604 = vmatpush1.bf16.msra.mxu1 %v3027_v2  ;;  %v3024_v55 = vcombine.high %v159_v45, %v163_v46  ;;  %v3031_v2 = vcombine.low %v167_v53, %v171_v54  ;;  %v3516_v23 = vld [vmem:[#allocation8 + $0x128] ss:$12 sps:$4 sm:$0xff]   ;;  %v3515_v37 = vld [vmem:[#allocation8 + $0x124] ss:$12 sps:$4 sm:$0xff]   ;;  %v3530_v46 = vld [vmem:[#allocation8 + $0x16c] ss:$12 sps:$4 sm:$0xff]  }
  0x8c   :  { %562 = vmatprep.subr.bf16.mxu0 %v3034_v56  ;;  %605 = vmatprep.subr.bf16.mxu1 %v3036_v5  ;;  %v3029_v56 = vcombine.low %v166_v42, %v170_v43  ;;  %v3474_v5 = vld [vmem:[#allocation8 + $0x1c] ss:$12 sps:$4 sm:$0xff]   ;;  %v3489_v24 = vld [vmem:[#allocation8 + $0x94] ss:$12 sps:$4 sm:$0xff]   ;;  %v3527_v45 = vld [vmem:[#allocation8 + $0x98] ss:$12 sps:$4 sm:$0xff]  }
  0x8d   :  { %v3490_v28 = vld [vmem:[#allocation8 + $0xa8] ss:$12 sps:$4 sm:$0xff]   ;;  %v3522_v42 = vld [vmem:[#allocation8 + $0x80] ss:$12 sps:$4 sm:$0xff]  }
  0x8e   :  { %v3525_v43 = vld [vmem:[#allocation8 + $0x154] ss:$12 sps:$4 sm:$0xff]  }
  0x8f   :  { %563 = vmatpush1.bf16.msra.mxu0 %v3033_v63  ;;  %606 = vmatpush1.bf16.msra.mxu1 %v3035_v11  ;;  %v3037_v63 = vcombine.low %v174_v49, %v178_v50  ;;  %v3501_v11 = vld [vmem:[#allocation8 + $0xe0] ss:$12 sps:$4 sm:$0xff]   ;;  %v3532_v49 = vld [vmem:[#allocation8 + $0xb0] ss:$12 sps:$4 sm:$0xff]  }
  0x90   :  { %634 = vmatprep.subr.bf16.mxu0 %v2982_v3  ;;  %677 = vmatprep.subr.bf16.mxu1 %v2984_v14  ;;  %v3040_v3 = vcombine.high %v175_v59, %v179_v60  ;;  %v3502_v14 = vld [vmem:[#allocation8 + $0x20] ss:$12 sps:$4 sm:$0xff]   ;;  %v3535_v50 = vld [vmem:[#allocation8 + $0x184] ss:$12 sps:$4 sm:$0xff]  }
  0x92   :  { %581 = vmatmul.mubr.bf16.vlgmr.msra.gmra.mrb[0].mxu0 %v4089_v1  ;;  %624 = vmatmul.mubr.bf16.vlgmr.msra.gmra.mrb[0].mxu1 %v4089_v1 }
  0x93   :  { %635 = vmatpush1.bf16.msra.mxu0 %v2981_v9  ;;  %666 = vmatprep.mubr.bf16.mxu0 %v3949_v0  ;;  %v3477_v9 = vld [vmem:[#allocation8 + $0x34] ss:$12 sps:$4 sm:$0xff]  }
  0x94   :  { %636 = vmatprep.subr.bf16.mxu0 %v2990_v12  ;;  %678 = vmatpush1.bf16.msra.mxu1 %v2983_v21  ;;  %v3475_v12 = vld [vmem:[#allocation8 + $0x30] ss:$12 sps:$4 sm:$0xff]  }
  0x95   :  { %679 = vmatprep.subr.bf16.mxu1 %v2992_v22  ;;  %709 = vmatprep.mubr.bf16.mxu1 %v3949_v0  ;;  %v3007_v0 = vcombine.low %v143_v31, %v147_v32  ;;  %v3486_v21 = vld [vmem:[#allocation8 + $0x7c] ss:$12 sps:$4 sm:$0xff]   ;;  %v3498_v32 = vld [vmem:[#allocation8 + $0xd8] ss:$12 sps:$4 sm:$0xff]  }
  0x96   :  { %v3512_v22 = vld [vmem:[#allocation8 + $0x50] ss:$12 sps:$4 sm:$0xff]  }
  0x97   :  { %637 = vmatpush1.bf16.msra.mxu0 %v2989_v17  ;;  %v3483_v17 = vld [vmem:[#allocation8 + $0x64] ss:$12 sps:$4 sm:$0xff]   ;;  %v3500_v31 = vld [vmem:[#allocation8 + $0xdc] ss:$12 sps:$4 sm:$0xff]  }
  0x98   :  { %638 = vmatprep.subr.bf16.mxu0 %v2998_v18  ;;  %680 = vmatpush1.bf16.msra.mxu1 %v2991_v29  ;;  %v3507_v18 = vld [vmem:[#allocation8 + $0x38] ss:$12 sps:$4 sm:$0xff]  }
  0x99   :  { %681 = vmatprep.subr.bf16.mxu1 %v3000_v30  ;;  %v3495_v29 = vld [vmem:[#allocation8 + $0xc4] ss:$12 sps:$4 sm:$0xff]   ;;  %v3493_v30 = vld [vmem:[#allocation8 + $0xc0] ss:$12 sps:$4 sm:$0xff]  }
  0x9b   :  { %639 = vmatpush1.bf16.msra.mxu0 %v2997_v25  ;;  %v3517_v25 = vld [vmem:[#allocation8 + $0x68] ss:$12 sps:$4 sm:$0xff]  }
  0x9c   :  { %640 = vmatprep.subr.bf16.mxu0 %v3006_v27  ;;  %682 = vmatpush1.bf16.msra.mxu1 %v2999_v36  ;;  %v3492_v27 = vld [vmem:[#allocation8 + $0xac] ss:$12 sps:$4 sm:$0xff]   ;;  %v3508_v36 = vld [vmem:[#allocation8 + $0x108] ss:$12 sps:$4 sm:$0xff]  }
  0x9d   :  { %683 = vmatprep.subr.bf16.mxu1 %v3008_v38  ;;  %v3513_v38 = vld [vmem:[#allocation8 + $0x120] ss:$12 sps:$4 sm:$0xff]  }
  0x9f   :  { %641 = vmatpush1.bf16.msra.mxu0 %v3005_v33  ;;  %v3505_v33 = vld [vmem:[#allocation8 + $0xf4] ss:$12 sps:$4 sm:$0xff]  }
  0xa0   :  { %642 = vmatprep.subr.bf16.mxu0 %v3014_v34  ;;  %684 = vmatpush1.bf16.msra.mxu1 %v3007_v0  ;;  %v3503_v34 = vld [vmem:[#allocation8 + $0xf0] ss:$12 sps:$4 sm:$0xff]  }
  0xa1   :  { %685 = vmatprep.subr.bf16.mxu1 %v3016_v47  ;;  %v3523_v0 = vld [vmem:[#allocation8 + $0x150] ss:$12 sps:$4 sm:$0xff]  }
  0xa2   :  { %v3531_v47 = vld [vmem:[#allocation8 + $0x170] ss:$12 sps:$4 sm:$0xff]  }
  0xa3   :  { %643 = vmatpush1.bf16.msra.mxu0 %v3013_v41  ;;  %v3518_v41 = vld [vmem:[#allocation8 + $0x138] ss:$12 sps:$4 sm:$0xff]  }
  0xa4   :  { %644 = vmatprep.subr.bf16.mxu0 %v3022_v44  ;;  %686 = vmatpush1.bf16.msra.mxu1 %v3015_v52  ;;  %v3526_v44 = vld [vmem:[#allocation8 + $0x158] ss:$12 sps:$4 sm:$0xff]   ;;  %v182_v52 = vlaneseq }
  0xa5   :  { %687 = vmatprep.subr.bf16.mxu1 %v3024_v55  ;;  %v4102_v55 = vld [vmem:[#allocation7] sm:$0xff] }
  0xa6   :  { %v4097_v53 = vshrl.u32 %v182_v52, 7  ;;  %v3553_v52 = vld [vmem:[#allocation8 + $0x1e0] ss:$12 sps:$4 sm:$0xff]  }
  0xa7   :  { %645 = vmatpush1.bf16.msra.mxu0 %v3021_v48  ;;  %v3528_v48 = vld [vmem:[#allocation8 + $0x168] ss:$12 sps:$4 sm:$0xff]  }
  0xa8   :  { %646 = vmatprep.subr.bf16.mxu0 %v3030_v51  ;;  %688 = vmatpush1.bf16.msra.mxu1 %v3023_v58  ;;  %v3536_v51 = vld [vmem:[#allocation8 + $0x248] ss:$12 sps:$4 sm:$0xff]   ;;  %v4100_v54 = vsub.s32 0, %v4097_v53  ;;  %v4112_v59 = vsub.s32 2, %v4097_v53  ;;  %v196_v60 = vsub.s32 3, %v4097_v53 }
  0xa9   :  { %689 = vmatprep.subr.bf16.mxu1 %v3032_v61 }
  0xab   :  { %647 = vmatpush1.bf16.msra.mxu0 %v3029_v56  ;;  %v4105_v56 = vsub.s32 1, %v4097_v53 }
  0xac   :  { %648 = vmatprep.subr.bf16.mxu0 %v3038_v57  ;;  %690 = vmatpush1.bf16.msra.mxu1 %v3031_v2  ;;  %v185_v57 = vrot.slane %v4102_v55, %v4100_v54 }
  0xad   :  { %691 = vmatprep.subr.bf16.mxu1 %v3040_v3  ;;  %v189_v58 = vrot.slane %v4102_v55, %v4105_v56 }
  0xaf   :  { %649 = vmatpush1.bf16.msra.mxu0 %v3037_v63 }
  0xb0   :  { %1417 = vmatprep.subr.bf16.mxu0 %v3471_v62  ;;  %692 = vmatpush1.bf16.msra.mxu1 %v3039_v7 }
  0xb1   :  { %3282 = vmatprep.subr.bf16.mxu1 %v3496_v6 }
  0xb2   :  { %667 = vmatmul.mubr.bf16.vlgmr.msra.gmra.mrb[4].mxu0 %v4089_v1 }
  0xb3   :  { %1418 = vmatpush1.bf16.msra.mxu0 %v3469_v4  ;;  %710 = vmatmul.mubr.bf16.vlgmr.msra.gmra.mrb[4].mxu1 %v4089_v1  ;;  %v3484_v1 = vld [vmem:[#allocation8 + $0x78] ss:$12 sps:$4 sm:$0xff]   ;;  %v193_v4 = vrot.slane %v4102_v55, %v4112_v59 }
  0xb4   :  { %1419 = vmatprep.subr.bf16.mxu0 %v3474_v5  ;;  %3283 = vmatpush3.bf16.msra.mxu1 %v3497_v10 }
  0xb5   :  { %3284 = vmatprep.subr.bf16.mxu1 %v3501_v11 }
  0xb7   :  { %1420 = vmatpush1.bf16.msra.mxu0 %v3472_v8  ;;  %v197_v8 = vrot.slane %v4102_v55, %v196_v60  ;;  %v3560_v60 = vld [vmem:[#allocation8 + $0x1fc] ss:$12 sps:$4 sm:$0xff]  }
  0xb8   :  { %1421 = vmatprep.subr.bf16.mxu0 %v3477_v9  ;;  %3285 = vmatpush3.bf16.msra.mxu1 %v3502_v14 }
  0xb9   :  { %3286 = vmatprep.subr.bf16.mxu1 %v3506_v15 }
  0xbb   :  { %1422 = vmatpush1.bf16.msra.mxu0 %v3475_v12 }
  0xbc   :  { %1423 = vmatprep.subr.bf16.mxu0 %v3480_v13  ;;  %3287 = vmatpush3.bf16.msra.mxu1 %v3507_v18 }
  0xbd   :  { %3288 = vmatprep.subr.bf16.mxu1 %v3511_v19 }
  0xbf   :  { %1424 = vmatpush1.bf16.msra.mxu0 %v3478_v16 }
  0xc0   :  { %1425 = vmatprep.subr.bf16.mxu0 %v3483_v17  ;;  %3289 = vmatpush3.bf16.msra.mxu1 %v3512_v22 }
  0xc1   :  { %3290 = vmatprep.subr.bf16.mxu1 %v3516_v23 }
  0xc3   :  { %1426 = vmatpush1.bf16.msra.mxu0 %v3481_v20 }
  0xc4   :  { %1427 = vmatprep.subr.bf16.mxu0 %v3486_v21  ;;  %3291 = vmatpush3.bf16.msra.mxu1 %v3517_v25 }
  0xc5   :  { %3292 = vmatprep.subr.bf16.mxu1 %v3521_v40 }
  0xc7   :  { %1428 = vmatpush1.bf16.msra.mxu0 %v3484_v1 }
  0xc8   :  { %1429 = vmatprep.subr.bf16.mxu0 %v3489_v24  ;;  %3293 = vmatpush3.bf16.msra.mxu1 %v3522_v42  ;;  %v3546_v42 = vld [vmem:[#allocation8 + $0x278] ss:$12 sps:$4 sm:$0xff]  }
  0xc9   :  { %3294 = vmatprep.subr.bf16.mxu1 %v3526_v44  ;;  %v3543_v44 = vld [vmem:[#allocation8 + $0x1b0] ss:$12 sps:$4 sm:$0xff]  }
  0xcb   :  { %1430 = vmatpush1.bf16.msra.mxu0 %v3487_v26 }
  0xcc   :  { %1431 = vmatprep.subr.bf16.mxu0 %v3492_v27  ;;  %3295 = vmatpush3.bf16.msra.mxu1 %v3527_v45  ;;  %v3550_v45 = vld [vmem:[#allocation8 + $0x1cc] ss:$12 sps:$4 sm:$0xff]  }
  0xcd   :  { %3296 = vmatprep.subr.bf16.mxu1 %v3531_v47  ;;  %v3548_v47 = vld [vmem:[#allocation8 + $0x1c8] ss:$12 sps:$4 sm:$0xff]  }
  0xcf   :  { %1432 = vmatpush1.bf16.msra.mxu0 %v3490_v28  ;;  %v3533_v28 = vld [vmem:[#allocation8 + $0x180] ss:$12 sps:$4 sm:$0xff]  }
  0xd0   :  { %1433 = vmatprep.subr.bf16.mxu0 %v3495_v29  ;;  %3297 = vmatpush3.bf16.msra.mxu1 %v3532_v49  ;;  %v3537_v29 = vld [vmem:[#allocation8 + $0x188] ss:$12 sps:$4 sm:$0xff]   ;;  %v3555_v49 = vld [vmem:[#allocation8 + $0x1e4] ss:$12 sps:$4 sm:$0xff]  }
  0xd1   :  { %3304 = vmatprep.subr.bf16.mxu1 %v3536_v51  ;;  %v200_v51 = vsub.s32 4, %v4097_v53 }
  0xd3   :  { %1434 = vmatpush1.bf16.msra.mxu0 %v3493_v30 }
  0xd4   :  { %1435 = vmatprep.subr.bf16.mxu0 %v3500_v31 }
  0xd7   :  { %1436 = vmatpush1.bf16.msra.mxu0 %v3498_v32  ;;  %v3540_v32 = vld [vmem:[#allocation8 + $0x19c] ss:$12 sps:$4 sm:$0xff]  }
  0xd8   :  { %1437 = vmatprep.subr.bf16.mxu0 %v3505_v33  ;;  %v3541_v33 = vld [vmem:[#allocation8 + $0x260] ss:$12 sps:$4 sm:$0xff]  }
  0xdb   :  { %1438 = vmatpush1.bf16.msra.mxu0 %v3503_v34 }
  0xdc   :  { %1439 = vmatprep.subr.bf16.mxu0 %v3510_v35 }
  0xdf   :  { %1440 = vmatpush1.bf16.msra.mxu0 %v3508_v36 }
  0xe0   :  { %1441 = vmatprep.subr.bf16.mxu0 %v3515_v37 }
  0xe3   :  { %1442 = vmatpush1.bf16.msra.mxu0 %v3513_v38  ;;  %v3538_v38 = vld [vmem:[#allocation8 + $0x198] ss:$12 sps:$4 sm:$0xff]  }
  0xe4   :  { %1443 = vmatprep.subr.bf16.mxu0 %v3520_v39  ;;  %v3542_v39 = vld [vmem:[#allocation8 + $0x1a0] ss:$12 sps:$4 sm:$0xff]  }
  0xe7   :  { %1444 = vmatpush1.bf16.msra.mxu0 %v3518_v41  ;;  %v3545_v41 = vld [vmem:[#allocation8 + $0x1b4] ss:$12 sps:$4 sm:$0xff]  }
  0xe8   :  { %1445 = vmatprep.subr.bf16.mxu0 %v3525_v43 }
  0xeb   :  { %1446 = vmatpush1.bf16.msra.mxu0 %v3523_v0  ;;  %v3547_v0 = vld [vmem:[#allocation8 + $0x1b8] ss:$12 sps:$4 sm:$0xff]  }
  0xec   :  { %1447 = vmatprep.subr.bf16.mxu0 %v3530_v46  ;;  %v3551_v46 = vld [vmem:[#allocation8 + $0x290] ss:$12 sps:$4 sm:$0xff]  }
  0xef   :  { %1448 = vmatpush1.bf16.msra.mxu0 %v3528_v48  ;;  %v3552_v48 = vld [vmem:[#allocation8 + $0x1d0] ss:$12 sps:$4 sm:$0xff]  }
  0xf0   :  { %1460 = vmatprep.subr.bf16.mxu0 %v3535_v50  ;;  %v3556_v50 = vld [vmem:[#allocation8 + $0x2a8] ss:$12 sps:$4 sm:$0xff]  }
 0x165   :  { %v582_v61 = vpop.f32.mrb[0].mxu0  ;;  %v625_v12 = vpop.f32.mrb[0].mxu1 }
 0x166   :  { %v583_v62 = vadd.f32 %v582_v61, %v185_v57  ;;  %v584_v63 = vpop.f32.mrb[1].mxu0  ;;  %v626_v14 = vadd.f32 %v625_v12, %v193_v4  ;;  %v627_v15 = vpop.f32.mrb[1].mxu1  ;;  %v3561_v61 = vld [vmem:[#allocation8 + $0x2c0] ss:$12 sps:$4 sm:$0xff]   ;;  %v3567_v12 = vld [vmem:[#allocation8 + $0x218] ss:$12 sps:$4 sm:$0xff]  }
 0x167   :  { %v585_v2 = vadd.f32 %v584_v63, %v189_v58  ;;  %v586_v3 = vpop.f32.mrb[2].mxu0  ;;  %v628_v18 = vadd.f32 %v627_v15, %v197_v8  ;;  %v629_v19 = vpop.f32.mrb[2].mxu1  ;;  %v3558_v63 = vld [vmem:[#allocation8 + $0x1f8] ss:$12 sps:$4 sm:$0xff]  }
 0x168   :  { %v720_v5 = vmul.f32 0.01, %v583_v62  ;;  %v587_v6 = vadd.f32 %v586_v3, %v185_v57  ;;  %v588_v7 = vpop.f32.mrb[3].mxu0  ;;  %v722_v22 = vmul.f32 0.01, %v626_v14  ;;  %v630_v23 = vadd.f32 %v629_v19, %v193_v4  ;;  %v631_v1 = vpop.f32.mrb[3].mxu1 }
 0x169   :  { %v721_v9 = vmul.f32 0.01, %v585_v2  ;;  %v589_v10 = vadd.f32 %v588_v7, %v189_v58  ;;  %v723_v25 = vmul.f32 0.01, %v628_v18  ;;  %v632_v26 = vadd.f32 %v631_v1, %v197_v8  ;;  %v3557_v57 = vld [vmem:[#allocation8 + $0x1e8] ss:$12 sps:$4 sm:$0xff]  }
 0x16a   :  { %v728_v11 = vmul.f32 0.01, %v587_v6  ;;  %v736_v16 = vmax.f32 %v583_v62, %v720_v5  ;;  %v738_v30 = vmax.f32 %v626_v14, %v722_v22  ;;  %v730_v31 = vmul.f32 0.01, %v630_v23  ;;  %v3565_v5 = vld [vmem:[#allocation8 + $0x214] ss:$12 sps:$4 sm:$0xff]  }
 0x16b   :  { %v729_v13 = vmul.f32 0.01, %v589_v10  ;;  %v737_v20 = vmax.f32 %v585_v2, %v721_v9  ;;  %v739_v34 = vmax.f32 %v628_v18, %v723_v25  ;;  %v731_v35 = vmul.f32 0.01, %v632_v26  ;;  %v3562_v2 = vld [vmem:[#allocation8 + $0x200] ss:$12 sps:$4 sm:$0xff]  }
 0x16c   :  { %v744_v17 = vmax.f32 %v587_v6, %v728_v11  ;;  %v746_v36 = vmax.f32 %v630_v23, %v730_v31  ;;  %v204_v58 = vsub.s32 5, %v4097_v53  ;;  %v201_v62 = vrot.slane %v4102_v55, %v200_v51  ;;  %v3566_v6 = vld [vmem:[#allocation8 + $0x2d8] ss:$12 sps:$4 sm:$0xff]   ;;  %v3563_v9 = vld [vmem:[#allocation8 + $0x210] ss:$12 sps:$4 sm:$0xff]  }
 0x16d   :  { %v745_v21 = vmax.f32 %v589_v10, %v729_v13  ;;  %v747_v37 = vmax.f32 %v632_v26, %v731_v35  ;;  %v208_v4 = vsub.s32 6, %v4097_v53  ;;  %v212_v7 = vsub.s32 7, %v4097_v53  ;;  %v3570_v13 = vld [vmem:[#allocation8 + $0x22c] ss:$12 sps:$4 sm:$0xff]   ;;  %v3568_v23 = vld [vmem:[#allocation8 + $0x228] ss:$12 sps:$4 sm:$0xff]  }
 0x16e   :  { %v752_v24 = vpack.c.bf16 %v744_v17, %v736_v16  ;;  %v4118_v40 = vpack.c.bf16 %v746_v36, %v738_v30  ;;  %v205_v3 = vrot.slane %v4102_v55, %v204_v58  ;;  %v3571_v17 = vld [vmem:[#allocation8 + $0x2f0] ss:$12 sps:$4 sm:$0xff]   ;;  %v3582_v58 = vld [vmem:[#allocation10 + $0x18] ss:$12 sps:$4 sm:$0xff]  }
 0x16f   :  { %v753_v27 = vpack.c.bf16 %v745_v21, %v737_v20  ;;  %v755_v43 = vpack.c.bf16 %v747_v37, %v739_v34  ;;  %v209_v16 = vrot.slane %v4102_v55, %v208_v4  ;;  %v213_v53 = vrot.slane %v4102_v55, %v212_v7  ;;  %v3572_v26 = vld [vmem:[#allocation8 + $0x230] ss:$12 sps:$4 sm:$0xff]   ;;  %v3593_v4 = vld [vmem:[#allocation8 + $0x28c] ss:$12 sps:$4 sm:$0xff]   ;;  %v3594_v7 = vld [vmem:[#allocation10 + $0x48] ss:$12 sps:$4 sm:$0xff]  }
 0x170   :  { %v3575_v31 = vld [vmem:[#allocation8 + $0x244] ss:$12 sps:$4 sm:$0xff]  }
 0x171   :  { %1449 = vmatprep.mubr.bf16.mxu0 %v753_v27  ;;  %1535 = vmatprep.mubr.bf16.mxu1 %v753_v27 }
 0x172   :  { %1450 = vmatmul.mubr.bf16.vlgmr.msra.gmra.mrb[8].mxu0 %v752_v24  ;;  %1536 = vmatmul.mubr.bf16.vlgmr.msra.gmra.mrb[8].mxu1 %v752_v24 }
 0x173   :  { %1461 = vmatpush1.bf16.msra.mxu0 %v3533_v28  ;;  %3305 = vmatpush3.bf16.msra.mxu1 %v3537_v29 }
 0x174   :  { %1462 = vmatprep.subr.bf16.mxu0 %v3540_v32  ;;  %3306 = vmatprep.subr.bf16.mxu1 %v3541_v33  ;;  %v3578_v32 = vld [vmem:[#allocation10 + $0x4] ss:$12 sps:$4 sm:$0xff]  }
 0x175   :  { %1492 = vmatprep.mubr.bf16.mxu0 %v755_v43  ;;  %1576 = vmatprep.mubr.bf16.mxu1 %v755_v43  ;;  %v3573_v43 = vld [vmem:[#allocation8 + $0x240] ss:$12 sps:$4 sm:$0xff]  }
 0x177   :  { %1463 = vmatpush1.bf16.msra.mxu0 %v3538_v38  ;;  %3307 = vmatpush3.bf16.msra.mxu1 %v3542_v39 }
 0x178   :  { %1464 = vmatprep.subr.bf16.mxu0 %v3545_v41  ;;  %3308 = vmatprep.subr.bf16.mxu1 %v3546_v42 }
 0x17b   :  { %1465 = vmatpush1.bf16.msra.mxu0 %v3543_v44  ;;  %3309 = vmatpush3.bf16.msra.mxu1 %v3547_v0  ;;  %v3576_v44 = vld [vmem:[#allocation10] ss:$12 sps:$4 sm:$0xff]  }
 0x17c   :  { %1466 = vmatprep.subr.bf16.mxu0 %v3550_v45  ;;  %3310 = vmatprep.subr.bf16.mxu1 %v3551_v46 }
 0x17f   :  { %1467 = vmatpush1.bf16.msra.mxu0 %v3548_v47  ;;  %3311 = vmatpush3.bf16.msra.mxu1 %v3552_v48  ;;  %v3581_v47 = vld [vmem:[#allocation8 + $0x25c] ss:$12 sps:$4 sm:$0xff]  }
 0x180   :  { %1468 = vmatprep.subr.bf16.mxu0 %v3555_v49  ;;  %3312 = vmatprep.subr.bf16.mxu1 %v3556_v50  ;;  %v3584_v48 = vld [vmem:[#allocation10 + $0x1c] ss:$12 sps:$4 sm:$0xff]  }
 0x183   :  { %1469 = vmatpush1.bf16.msra.mxu0 %v3553_v52  ;;  %3313 = vmatpush3.bf16.msra.mxu1 %v3557_v57  ;;  %v3579_v57 = vld [vmem:[#allocation8 + $0x258] ss:$12 sps:$4 sm:$0xff]  }
 0x184   :  { %1470 = vmatprep.subr.bf16.mxu0 %v3560_v60  ;;  %3314 = vmatprep.subr.bf16.mxu1 %v3561_v61  ;;  %v3587_v61 = vld [vmem:[#allocation8 + $0x274] ss:$12 sps:$4 sm:$0xff]  }
 0x185   :  { %v668_v8 = vpop.f32.mrb[4].mxu0 }
 0x186   :  { %v669_v10 = vadd.f32 %v668_v8, %v201_v62  ;;  %v670_v11 = vpop.f32.mrb[5].mxu0  ;;  %v711_v25 = vpop.f32.mrb[4].mxu1  ;;  %v3599_v8 = vld [vmem:[#allocation8 + $0x2a4] ss:$12 sps:$4 sm:$0xff]  }
 0x187   :  { %1471 = vmatpush1.bf16.msra.mxu0 %v3558_v63  ;;  %3315 = vmatpush3.bf16.msra.mxu1 %v3562_v2  ;;  %v671_v14 = vadd.f32 %v670_v11, %v205_v3  ;;  %v672_v15 = vpop.f32.mrb[6].mxu0  ;;  %v712_v29 = vadd.f32 %v711_v25, %v209_v16  ;;  %v713_v30 = vpop.f32.mrb[5].mxu1  ;;  %v3585_v2 = vld [vmem:[#allocation8 + $0x270] ss:$12 sps:$4 sm:$0xff]   ;;  %v3600_v11 = vld [vmem:[#allocation10 + $0x60] ss:$12 sps:$4 sm:$0xff]  }
 0x188   :  { %1472 = vmatprep.subr.bf16.mxu0 %v3565_v5  ;;  %3316 = vmatprep.subr.bf16.mxu1 %v3566_v6  ;;  %v724_v18 = vmul.f32 0.01, %v669_v10  ;;  %v673_v19 = vadd.f32 %v672_v15, %v201_v62  ;;  %v674_v20 = vpop.f32.mrb[7].mxu0  ;;  %v714_v34 = vadd.f32 %v713_v30, %v213_v53  ;;  %v715_v55 = vpop.f32.mrb[6].mxu1  ;;  %v3590_v62 = vld [vmem:[#allocation10 + $0x34] ss:$12 sps:$4 sm:$0xff]  }
 0x189   :  { %v725_v21 = vmul.f32 0.01, %v671_v14  ;;  %v675_v22 = vadd.f32 %v674_v20, %v205_v3  ;;  %v726_v36 = vmul.f32 0.01, %v712_v29  ;;  %v716_v37 = vadd.f32 %v715_v55, %v209_v16  ;;  %v717_v38 = vpop.f32.mrb[7].mxu1 }
 0x18a   :  { %v740_v1 = vmax.f32 %v669_v10, %v724_v18  ;;  %v732_v24 = vmul.f32 0.01, %v673_v19  ;;  %v727_v41 = vmul.f32 0.01, %v714_v34  ;;  %v718_v42 = vadd.f32 %v717_v38, %v213_v53  ;;  %v3588_v3 = vld [vmem:[#allocation10 + $0x30] ss:$12 sps:$4 sm:$0xff]  }
 0x18b   :  { %1473 = vmatpush1.bf16.msra.mxu0 %v3563_v9  ;;  %3317 = vmatpush3.bf16.msra.mxu1 %v3567_v12  ;;  %v741_v27 = vmax.f32 %v671_v14, %v725_v21  ;;  %v733_v28 = vmul.f32 0.01, %v675_v22  ;;  %v742_v45 = vmax.f32 %v712_v29, %v726_v36  ;;  %v734_v46 = vmul.f32 0.01, %v716_v37  ;;  %v3596_v5 = vld [vmem:[#allocation10 + $0x4c] ss:$12 sps:$4 sm:$0xff]  }
 0x18c   :  { %1474 = vmatprep.subr.bf16.mxu0 %v3570_v13  ;;  %3318 = vmatprep.subr.bf16.mxu1 %v3571_v17  ;;  %v748_v33 = vmax.f32 %v673_v19, %v732_v24  ;;  %v743_v49 = vmax.f32 %v714_v34, %v727_v41  ;;  %v735_v50 = vmul.f32 0.01, %v718_v42  ;;  %v3591_v6 = vld [vmem:[#allocation8 + $0x288] ss:$12 sps:$4 sm:$0xff]   ;;  %v3602_v9 = vld [vmem:[#allocation10 + $0x64] ss:$12 sps:$4 sm:$0xff]  }
 0x18d   :  { %v749_v35 = vmax.f32 %v675_v22, %v733_v28  ;;  %v750_v51 = vmax.f32 %v716_v37, %v734_v46  ;;  %v3597_v10 = vld [vmem:[#allocation8 + $0x2a0] ss:$12 sps:$4 sm:$0xff]   ;;  %v3605_v12 = vld [vmem:[#allocation8 + $0x2bc] ss:$12 sps:$4 sm:$0xff]   ;;  %v3603_v14 = vld [vmem:[#allocation8 + $0x2b8] ss:$12 sps:$4 sm:$0xff]  }
 0x18e   :  { %v4128_v39 = vpack.c.bf16 %v748_v33, %v740_v1  ;;  %v751_v52 = vmax.f32 %v718_v42, %v735_v50  ;;  %v3608_v13 = vld [vmem:[#allocation10 + $0x7c] ss:$12 sps:$4 sm:$0xff]   ;;  %v3606_v15 = vld [vmem:[#allocation10 + $0x78] ss:$12 sps:$4 sm:$0xff]   ;;  %v3611_v16 = vld [vmem:[#allocation8 + $0x2d4] ss:$12 sps:$4 sm:$0xff]  }
 0x18f   :  { %1475 = vmatpush1.bf16.msra.mxu0 %v3568_v23  ;;  %3319 = vmatpush3.bf16.msra.mxu1 %v3572_v26  ;;  %v4130_v0 = vpack.c.bf16 %v749_v35, %v741_v27  ;;  %v4133_v60 = vpack.c.bf16 %v750_v51, %v742_v45  ;;  %v3614_v17 = vld [vmem:[#allocation10 + $0x94] ss:$12 sps:$4 sm:$0xff]   ;;  %v3609_v18 = vld [vmem:[#allocation8 + $0x2d0] ss:$12 sps:$4 sm:$0xff]   ;;  %v3617_v20 = vld [vmem:[#allocation8 + $0x2ec] ss:$12 sps:$4 sm:$0xff]  }
 0x190   :  { %1476 = vmatprep.subr.bf16.mxu0 %v3575_v31  ;;  %2257 = vmatprep.subr.bf16.mxu1 %v3578_v32  ;;  %v4135_v63 = vpack.c.bf16 %v751_v52, %v743_v49  ;;  %v3612_v19 = vld [vmem:[#allocation10 + $0x90] ss:$12 sps:$4 sm:$0xff]   ;;  %v3620_v53 = vld [vmem:[#allocation10 + $0xac] ss:$12 sps:$4 sm:$0xff]   ;;  %v3615_v21 = vld [vmem:[#allocation8 + $0x2e8] ss:$12 sps:$4 sm:$0xff]  }
 0x191   :  { %v3618_v22 = vld [vmem:[#allocation10 + $0xa8] ss:$12 sps:$4 sm:$0xff]   ;;  %v3623_v23 = vld [vmem:[#allocation10 + $0xc4] ss:$12 sps:$4 sm:$0xff]   ;;  %v3621_v24 = vld [vmem:[#allocation10 + $0xc0] ss:$12 sps:$4 sm:$0xff]  }
 0x192   :  { %1577 = vmatmul.mubr.bf16.vlgmr.msra.gmra.mrb[12].mxu1 %v4118_v40  ;;  %v3624_v1 = vld [vmem:[#allocation10 + $0xc8] ss:$12 sps:$4 sm:$0xff]   ;;  %v3629_v27 = vld [vmem:[#allocation10 + $0xe0] ss:$12 sps:$4 sm:$0xff]   ;;  %v3626_v28 = vld [vmem:[#allocation10 + $0xd8] ss:$12 sps:$4 sm:$0xff]  }
 0x193   :  { %1477 = vmatpush1.bf16.msra.mxu0 %v3573_v43  ;;  %2258 = vmatpush1.bf16.msra.mxu1 %v3576_v44  ;;  %v3625_v25 = vld [vmem:[#allocation10 + $0x8] ss:$12 sps:$4 sm:$0xff]   ;;  %v3630_v29 = vld [vmem:[#allocation10 + $0x20] ss:$12 sps:$4 sm:$0xff]   ;;  %v3634_v31 = vld [vmem:[#allocation10 + $0xf8] ss:$12 sps:$4 sm:$0xff]  }
 0x194   :  { %1478 = vmatprep.subr.bf16.mxu0 %v3581_v47  ;;  %2259 = vmatprep.subr.bf16.mxu1 %v3584_v48  ;;  %v3628_v26 = vld [vmem:[#allocation10 + $0xdc] ss:$12 sps:$4 sm:$0xff]   ;;  %v3633_v30 = vld [vmem:[#allocation10 + $0xf4] ss:$12 sps:$4 sm:$0xff]   ;;  %v3635_v33 = vld [vmem:[#allocation10 + $0x38] ss:$12 sps:$4 sm:$0xff]  }
 0x195   :  { %2289 = vmatprep.mubr.bf16.mxu1 %v4130_v0  ;;  %v3631_v32 = vld [vmem:[#allocation10 + $0xf0] ss:$12 sps:$4 sm:$0xff]   ;;  %v3638_v34 = vld [vmem:[#allocation10 + $0x10c] ss:$12 sps:$4 sm:$0xff]   ;;  %v3644_v37 = vld [vmem:[#allocation10 + $0x128] ss:$12 sps:$4 sm:$0xff]  }
 0x196   :  { %v3639_v55 = vld [vmem:[#allocation10 + $0x110] ss:$12 sps:$4 sm:$0xff]   ;;  %v3641_v38 = vld [vmem:[#allocation10 + $0x120] ss:$12 sps:$4 sm:$0xff]   ;;  %v3645_v41 = vld [vmem:[#allocation10 + $0x68] ss:$12 sps:$4 sm:$0xff]  }
 0x197   :  { %1479 = vmatpush1.bf16.msra.mxu0 %v3579_v57  ;;  %2260 = vmatpush1.bf16.msra.mxu1 %v3582_v58  ;;  %v3640_v35 = vld [vmem:[#allocation10 + $0x50] ss:$12 sps:$4 sm:$0xff]   ;;  %v3649_v43 = vld [vmem:[#allocation10 + $0x140] ss:$12 sps:$4 sm:$0xff]   ;;  %v3646_v44 = vld [vmem:[#allocation10 + $0x138] ss:$12 sps:$4 sm:$0xff]  }
 0x198   :  { %1480 = vmatprep.subr.bf16.mxu0 %v3587_v61  ;;  %2261 = vmatprep.subr.bf16.mxu1 %v3590_v62  ;;  %v3643_v36 = vld [vmem:[#allocation10 + $0x124] ss:$12 sps:$4 sm:$0xff]   ;;  %v3648_v42 = vld [vmem:[#allocation10 + $0x13c] ss:$12 sps:$4 sm:$0xff]   ;;  %v3653_v45 = vld [vmem:[#allocation10 + $0x154] ss:$12 sps:$4 sm:$0xff]  }
 0x199   :  { %v3654_v46 = vld [vmem:[#allocation10 + $0x158] ss:$12 sps:$4 sm:$0xff]   ;;  %v3651_v47 = vld [vmem:[#allocation10 + $0x150] ss:$12 sps:$4 sm:$0xff]   ;;  %v3656_v51 = vld [vmem:[#allocation10 + $0x168] ss:$12 sps:$4 sm:$0xff]  }
 0x19a   :  { %v3655_v48 = vld [vmem:[#allocation10 + $0x98] ss:$12 sps:$4 sm:$0xff]   ;;  %v3659_v50 = vld [vmem:[#allocation10 + $0x170] ss:$12 sps:$4 sm:$0xff]   ;;  %v3664_v58 = vld [vmem:[#allocation10 + $0x248] ss:$12 sps:$4 sm:$0xff]  }
 0x19b   :  { %1481 = vmatpush1.bf16.msra.mxu0 %v3585_v2  ;;  %2262 = vmatpush1.bf16.msra.mxu1 %v3588_v3  ;;  %v3658_v49 = vld [vmem:[#allocation10 + $0x16c] ss:$12 sps:$4 sm:$0xff]   ;;  %v3660_v52 = vld [vmem:[#allocation10 + $0xb0] ss:$12 sps:$4 sm:$0xff]   ;;  %v3665_v62 = vld [vmem:[#allocation10 + $0x188] ss:$12 sps:$4 sm:$0xff]  }
 0x19c   :  { %1482 = vmatprep.subr.bf16.mxu0 %v3593_v4  ;;  %2263 = vmatprep.subr.bf16.mxu1 %v3596_v5  ;;  %v3663_v57 = vld [vmem:[#allocation10 + $0x184] ss:$12 sps:$4 sm:$0xff]   ;;  %v3661_v61 = vld [vmem:[#allocation10 + $0x180] ss:$12 sps:$4 sm:$0xff]   ;;  %v3668_v2 = vld [vmem:[#allocation10 + $0x19c] ss:$12 sps:$4 sm:$0xff]  }
 0x19d   :  { %v3669_v3 = vld [vmem:[#allocation10 + $0x260] ss:$12 sps:$4 sm:$0xff]   ;;  %v3666_v4 = vld [vmem:[#allocation10 + $0x198] ss:$12 sps:$4 sm:$0xff]  }
 0x19e   :  { %v3670_v5 = vld [vmem:[#allocation10 + $0x1a0] ss:$12 sps:$4 sm:$0xff]  }
 0x19f   :  { %1483 = vmatpush1.bf16.msra.mxu0 %v3591_v6  ;;  %2264 = vmatpush1.bf16.msra.mxu1 %v3594_v7  ;;  %v3673_v6 = vld [vmem:[#allocation10 + $0x1b4] ss:$12 sps:$4 sm:$0xff]   ;;  %v3674_v7 = vld [vmem:[#allocation10 + $0x278] ss:$12 sps:$4 sm:$0xff]  }
 0x1a0   :  { %1484 = vmatprep.subr.bf16.mxu0 %v3599_v8  ;;  %2265 = vmatprep.subr.bf16.mxu1 %v3602_v9  ;;  %v3671_v8 = vld [vmem:[#allocation10 + $0x1b0] ss:$12 sps:$4 sm:$0xff]   ;;  %v3675_v9 = vld [vmem:[#allocation10 + $0x1b8] ss:$12 sps:$4 sm:$0xff]  }
 0x1a3   :  { %1485 = vmatpush1.bf16.msra.mxu0 %v3597_v10  ;;  %2266 = vmatpush1.bf16.msra.mxu1 %v3600_v11  ;;  %v3678_v10 = vld [vmem:[#allocation10 + $0x1cc] ss:$12 sps:$4 sm:$0xff]   ;;  %v3676_v11 = vld [vmem:[#allocation10 + $0x1c8] ss:$12 sps:$4 sm:$0xff]  }
 0x1a4   :  { %1486 = vmatprep.subr.bf16.mxu0 %v3605_v12  ;;  %2267 = vmatprep.subr.bf16.mxu1 %v3608_v13  ;;  %v3680_v12 = vld [vmem:[#allocation10 + $0x1d0] ss:$12 sps:$4 sm:$0xff]  }
 0x1a5   :  { %v3683_v13 = vld [vmem:[#allocation10 + $0x1e4] ss:$12 sps:$4 sm:$0xff]  }
 0x1a7   :  { %1487 = vmatpush1.bf16.msra.mxu0 %v3603_v14  ;;  %2268 = vmatpush1.bf16.msra.mxu1 %v3606_v15  ;;  %v3684_v14 = vld [vmem:[#allocation10 + $0x2a8] ss:$12 sps:$4 sm:$0xff]   ;;  %v3681_v15 = vld [vmem:[#allocation10 + $0x1e0] ss:$12 sps:$4 sm:$0xff]  }
 0x1a8   :  { %1488 = vmatprep.subr.bf16.mxu0 %v3611_v16  ;;  %2269 = vmatprep.subr.bf16.mxu1 %v3614_v17  ;;  %v3688_v16 = vld [vmem:[#allocation10 + $0x1fc] ss:$12 sps:$4 sm:$0xff]   ;;  %v3689_v17 = vld [vmem:[#allocation10 + $0x2c0] ss:$12 sps:$4 sm:$0xff]  }
 0x1ab   :  { %1489 = vmatpush1.bf16.msra.mxu0 %v3609_v18  ;;  %2270 = vmatpush1.bf16.msra.mxu1 %v3612_v19  ;;  %v3686_v18 = vld [vmem:[#allocation10 + $0x1f8] ss:$12 sps:$4 sm:$0xff]   ;;  %v3690_v19 = vld [vmem:[#allocation10 + $0x200] ss:$12 sps:$4 sm:$0xff]  }
 0x1ac   :  { %1490 = vmatprep.subr.bf16.mxu0 %v3617_v20  ;;  %2271 = vmatprep.subr.bf16.mxu1 %v3620_v53  ;;  %v3693_v20 = vld [vmem:[#allocation10 + $0x214] ss:$12 sps:$4 sm:$0xff]   ;;  %v3694_v53 = vld [vmem:[#allocation10 + $0x2d8] ss:$12 sps:$4 sm:$0xff]  }
 0x1af   :  { %1491 = vmatpush1.bf16.msra.mxu0 %v3615_v21  ;;  %2272 = vmatpush1.bf16.msra.mxu1 %v3618_v22  ;;  %v3691_v21 = vld [vmem:[#allocation10 + $0x210] ss:$12 sps:$4 sm:$0xff]   ;;  %v3695_v22 = vld [vmem:[#allocation10 + $0x218] ss:$12 sps:$4 sm:$0xff]  }
 0x1b0   :  { %2273 = vmatprep.subr.bf16.mxu1 %v3623_v23  ;;  %3326 = vmatprep.subr.bf16.mxu0 %v3624_v1  ;;  %v3698_v23 = vld [vmem:[#allocation10 + $0x22c] ss:$12 sps:$4 sm:$0xff]   ;;  %v3699_v1 = vld [vmem:[#allocation10 + $0x2f0] ss:$12 sps:$4 sm:$0xff]  }
 0x1b2   :  { %1493 = vmatmul.mubr.bf16.vlgmr.msra.gmra.mrb[8].mxu0 %v4118_v40  ;;  %v3636_v40 = vld [vmem:[#allocation10 + $0x108] ss:$12 sps:$4 sm:$0xff]  }
 0x1b3   :  { %2274 = vmatpush1.bf16.msra.mxu1 %v3621_v24  ;;  %3327 = vmatpush3.bf16.msra.mxu0 %v3625_v25  ;;  %v3696_v24 = vld [vmem:[#allocation10 + $0x228] ss:$12 sps:$4 sm:$0xff]   ;;  %v3700_v25 = vld [vmem:[#allocation10 + $0x230] ss:$12 sps:$4 sm:$0xff]  }
 0x1b4   :  { %2275 = vmatprep.subr.bf16.mxu1 %v3628_v26  ;;  %3328 = vmatprep.subr.bf16.mxu0 %v3629_v27  ;;  %v3703_v26 = vld [vmem:[#allocation10 + $0x244] ss:$12 sps:$4 sm:$0xff]   ;;  %v3701_v27 = vld [vmem:[#allocation10 + $0x240] ss:$12 sps:$4 sm:$0xff]  }
 0x1b5   :  { %2375 = vmatprep.mubr.bf16.mxu0 %v4130_v0  ;;  %v3650_v0 = vld [vmem:[#allocation10 + $0x80] ss:$12 sps:$4 sm:$0xff]  }
 0x1b7   :  { %2276 = vmatpush1.bf16.msra.mxu1 %v3626_v28  ;;  %3329 = vmatpush3.bf16.msra.mxu0 %v3630_v29  ;;  %v3706_v28 = vld [vmem:[#allocation10 + $0x25c] ss:$12 sps:$4 sm:$0xff]   ;;  %v3725_v29 = vld [vmem:[#allocation11 + $0x40] sm:$0xff]  }
 0x1b8   :  { %2277 = vmatprep.subr.bf16.mxu1 %v3633_v30  ;;  %3330 = vmatprep.subr.bf16.mxu0 %v3634_v31  ;;  %v3726_v30 = vld [vmem:[#allocation11] sm:$0xff]   ;;  %v3727_v31 = vld [vmem:[#allocation11 + $0x48] sm:$0xff]  }
 0x1bb   :  { %2278 = vmatpush1.bf16.msra.mxu1 %v3631_v32  ;;  %3331 = vmatpush3.bf16.msra.mxu0 %v3635_v33  ;;  %v3704_v32 = vld [vmem:[#allocation10 + $0x258] ss:$12 sps:$4 sm:$0xff]   ;;  %v3728_v33 = vld [vmem:[#allocation11 + $0x8] sm:$0xff]  }
 0x1bc   :  { %2279 = vmatprep.subr.bf16.mxu1 %v3638_v34  ;;  %3332 = vmatprep.subr.bf16.mxu0 %v3639_v55  ;;  %v3709_v34 = vld [vmem:[#allocation10 + $0x274] ss:$12 sps:$4 sm:$0xff]  }
 0x1bd   :  { %v3729_v55 = vld [vmem:[#allocation11 + $0x50] sm:$0xff]  }
 0x1bf   :  { %2280 = vmatpush1.bf16.msra.mxu1 %v3636_v40  ;;  %3333 = vmatpush3.bf16.msra.mxu0 %v3640_v35  ;;  %v3707_v40 = vld [vmem:[#allocation10 + $0x270] ss:$12 sps:$4 sm:$0xff]  }
 0x1c0   :  { %2281 = vmatprep.subr.bf16.mxu1 %v3643_v36  ;;  %3334 = vmatprep.subr.bf16.mxu0 %v3644_v37  ;;  %v3730_v35 = vld [vmem:[#allocation11 + $0x10] sm:$0xff]   ;;  %v3712_v36 = vld [vmem:[#allocation10 + $0x28c] ss:$12 sps:$4 sm:$0xff]  }
 0x1c1   :  { %v3731_v37 = vld [vmem:[#allocation11 + $0x58] sm:$0xff]  }
 0x1c3   :  { %2282 = vmatpush1.bf16.msra.mxu1 %v3641_v38  ;;  %3335 = vmatpush3.bf16.msra.mxu0 %v3645_v41  ;;  %v3710_v38 = vld [vmem:[#allocation10 + $0x288] ss:$12 sps:$4 sm:$0xff]   ;;  %v3732_v41 = vld [vmem:[#allocation11 + $0x18] sm:$0xff]  }
 0x1c4   :  { %2283 = vmatprep.subr.bf16.mxu1 %v3648_v42  ;;  %3336 = vmatprep.subr.bf16.mxu0 %v3649_v43  ;;  %v3715_v42 = vld [vmem:[#allocation10 + $0x2a4] ss:$12 sps:$4 sm:$0xff]  }
 0x1c5   :  { %v3733_v43 = vld [vmem:[#allocation11 + $0x60] sm:$0xff]  }
 0x1c7   :  { %2284 = vmatpush1.bf16.msra.mxu1 %v3646_v44  ;;  %3337 = vmatpush3.bf16.msra.mxu0 %v3650_v0  ;;  %v3713_v44 = vld [vmem:[#allocation10 + $0x2a0] ss:$12 sps:$4 sm:$0xff]  }
 0x1c8   :  { %2285 = vmatprep.subr.bf16.mxu1 %v3653_v45  ;;  %3338 = vmatprep.subr.bf16.mxu0 %v3654_v46  ;;  %v3734_v0 = vld [vmem:[#allocation11 + $0x20] sm:$0xff]   ;;  %v3718_v45 = vld [vmem:[#allocation10 + $0x2bc] ss:$12 sps:$4 sm:$0xff]  }
 0x1c9   :  { %v3716_v46 = vld [vmem:[#allocation10 + $0x2b8] ss:$12 sps:$4 sm:$0xff]  }
 0x1cb   :  { %2286 = vmatpush1.bf16.msra.mxu1 %v3651_v47  ;;  %3339 = vmatpush3.bf16.msra.mxu0 %v3655_v48  ;;  %v3721_v47 = vld [vmem:[#allocation10 + $0x2d4] ss:$12 sps:$4 sm:$0xff]   ;;  %v3735_v48 = vld [vmem:[#allocation11 + $0x68] sm:$0xff]  }
 0x1cc   :  { %2287 = vmatprep.subr.bf16.mxu1 %v3658_v49  ;;  %3340 = vmatprep.subr.bf16.mxu0 %v3659_v50  ;;  %v3736_v49 = vld [vmem:[#allocation11 + $0x28] sm:$0xff]   ;;  %v3719_v50 = vld [vmem:[#allocation10 + $0x2d0] ss:$12 sps:$4 sm:$0xff]  }
 0x1cf   :  { %2288 = vmatpush1.bf16.msra.mxu1 %v3656_v51  ;;  %3341 = vmatpush3.bf16.msra.mxu0 %v3660_v52  ;;  %v3724_v51 = vld [vmem:[#allocation10 + $0x2ec] ss:$12 sps:$4 sm:$0xff]   ;;  %v3737_v52 = vld [vmem:[#allocation11 + $0x70] sm:$0xff]  }
 0x1d0   :  { %2300 = vmatprep.subr.bf16.mxu1 %v3663_v57  ;;  %3348 = vmatprep.subr.bf16.mxu0 %v3664_v58  ;;  %v3738_v57 = vld [vmem:[#allocation11 + $0x30] sm:$0xff]  }
 0x1d1   :  { %v3722_v58 = vld [vmem:[#allocation10 + $0x2e8] ss:$12 sps:$4 sm:$0xff]  }
 0x1d2   :  { %2290 = vmatmul.mubr.bf16.vlgmr.msra.gmra.mrb[16].mxu1 %v4128_v39  ;;  %2376 = vmatmul.mubr.bf16.vlgmr.msra.gmra.mrb[12].mxu0 %v4128_v39  ;;  %v3679_v39 = vld [vmem:[#allocation10 + $0x290] ss:$12 sps:$4 sm:$0xff]  }
 0x1d3   :  { %2301 = vmatpush1.bf16.msra.mxu1 %v3661_v61  ;;  %3349 = vmatpush3.bf16.msra.mxu0 %v3665_v62  ;;  %v3739_v61 = vld [vmem:[#allocation11 + $0x78] sm:$0xff]  }
 0x1d4   :  { %2302 = vmatprep.subr.bf16.mxu1 %v3668_v2  ;;  %3350 = vmatprep.subr.bf16.mxu0 %v3669_v3  ;;  %v3740_v62 = vld [vmem:[#allocation11 + $0x38] sm:$0xff]   ;;  %v888_v2 = vld [vmem:[%s4180_s4] sm:$0x7] }
 0x1d5   :  { %2416 = vmatprep.mubr.bf16.mxu0 %v4135_v63  ;;  %2332 = vmatprep.mubr.bf16.mxu1 %v4135_v63  ;;  %v3685_v63 = vld [vmem:[#allocation10 + $0x1e8] ss:$12 sps:$4 sm:$0xff]  }
 0x1d7   :  { %2303 = vmatpush1.bf16.msra.mxu1 %v3666_v4  ;;  %3351 = vmatpush3.bf16.msra.mxu0 %v3670_v5  ;;  %v901_v4 = vrot.slane %v888_v2, %v4112_v59 }
 0x1d8   :  { %2304 = vmatprep.subr.bf16.mxu1 %v3673_v6  ;;  %3352 = vmatprep.subr.bf16.mxu0 %v3674_v7 }
 0x1db   :  { %2305 = vmatpush1.bf16.msra.mxu1 %v3671_v8  ;;  %3353 = vmatpush3.bf16.msra.mxu0 %v3675_v9 }
 0x1dc   :  { %2306 = vmatprep.subr.bf16.mxu1 %v3678_v10  ;;  %3354 = vmatprep.subr.bf16.mxu0 %v3679_v39 }
 0x1df   :  { %2307 = vmatpush1.bf16.msra.mxu1 %v3676_v11  ;;  %3355 = vmatpush3.bf16.msra.mxu0 %v3680_v12  ;;  %v3741_v11 = vld [vmem:[#allocation11 + $0xc0] sm:$0xff]  }
 0x1e0   :  { %2308 = vmatprep.subr.bf16.mxu1 %v3683_v13  ;;  %3356 = vmatprep.subr.bf16.mxu0 %v3684_v14  ;;  %v3742_v12 = vld [vmem:[#allocation11 + $0x140] sm:$0xff]   ;;  %v3747_v14 = vld [vmem:[#allocation11 + $0x88] sm:$0xff]  }
 0x1e1   :  { %v3743_v13 = vld [vmem:[#allocation11 + $0x80] sm:$0xff]  }
 0x1e3   :  { %2309 = vmatpush1.bf16.msra.mxu1 %v3681_v15  ;;  %3357 = vmatpush3.bf16.msra.mxu0 %v3685_v63  ;;  %v3749_v15 = vld [vmem:[#allocation11 + $0xd0] sm:$0xff]  }
 0x1e4   :  { %2310 = vmatprep.subr.bf16.mxu1 %v3688_v16  ;;  %3358 = vmatprep.subr.bf16.mxu0 %v3689_v17  ;;  %v3751_v63 = vld [vmem:[#allocation11 + $0x90] sm:$0xff]   ;;  %v3753_v16 = vld [vmem:[#allocation11 + $0xd8] sm:$0xff]  }
 0x1e5   :  { %v3755_v17 = vld [vmem:[#allocation11 + $0x98] sm:$0xff]  }
 0x1e7   :  { %2311 = vmatpush1.bf16.msra.mxu1 %v3686_v18  ;;  %3359 = vmatpush3.bf16.msra.mxu0 %v3690_v19  ;;  %v3757_v18 = vld [vmem:[#allocation11 + $0xe0] sm:$0xff]  }
 0x1e8   :  { %2312 = vmatprep.subr.bf16.mxu1 %v3693_v20  ;;  %3360 = vmatprep.subr.bf16.mxu0 %v3694_v53  ;;  %v3759_v19 = vld [vmem:[#allocation11 + $0xa0] sm:$0xff]   ;;  %v3761_v20 = vld [vmem:[#allocation11 + $0xe8] sm:$0xff]  }
 0x1e9   :  { %v3763_v53 = vld [vmem:[#allocation11 + $0xa8] sm:$0xff]  }
 0x1eb   :  { %2313 = vmatpush1.bf16.msra.mxu1 %v3691_v21  ;;  %3361 = vmatpush3.bf16.msra.mxu0 %v3695_v22 }
 0x1ec   :  { %2314 = vmatprep.subr.bf16.mxu1 %v3698_v23  ;;  %3362 = vmatprep.subr.bf16.mxu0 %v3699_v1 }
 0x1ef   :  { %2315 = vmatpush1.bf16.msra.mxu1 %v3696_v24  ;;  %3363 = vmatpush3.bf16.msra.mxu0 %v3700_v25  ;;  %v3765_v24 = vld [vmem:[#allocation11 + $0xf0] sm:$0xff]  }
 0x1f0   :  { %2316 = vmatprep.subr.bf16.mxu1 %v3703_v26  ;;  %3370 = vmatprep.subr.bf16.mxu0 %v3725_v29  ;;  %v3767_v26 = vld [vmem:[#allocation11 + $0xb0] sm:$0xff]  }
 0x1f2   :  { %2417 = vmatmul.mubr.bf16.vlgmr.msra.gmra.mrb[16].mxu0 %v4133_v60 }
 0x1f3   :  { %2317 = vmatpush1.bf16.msra.mxu1 %v3701_v27  ;;  %3371 = vmatpush3.bf16.msra.mxu0 %v3726_v30 }
 0x1f4   :  { %2318 = vmatprep.subr.bf16.mxu1 %v3706_v28  ;;  %3372 = vmatprep.subr.bf16.mxu0 %v3727_v31  ;;  %v3769_v31 = vld [vmem:[#allocation11 + $0xf8] sm:$0xff]  }
 0x1f7   :  { %2319 = vmatpush1.bf16.msra.mxu1 %v3704_v32  ;;  %3373 = vmatpush3.bf16.msra.mxu0 %v3728_v33  ;;  %v3771_v32 = vld [vmem:[#allocation11 + $0xb8] sm:$0xff]  }
 0x1f8   :  { %2320 = vmatprep.subr.bf16.mxu1 %v3709_v34  ;;  %3374 = vmatprep.subr.bf16.mxu0 %v3729_v55 }
 0x1fb   :  { %2321 = vmatpush1.bf16.msra.mxu1 %v3707_v40  ;;  %3375 = vmatpush3.bf16.msra.mxu0 %v3730_v35  ;;  %v893_v35 = vrot.slane %v888_v2, %v4100_v54 }
 0x1fc   :  { %2322 = vmatprep.subr.bf16.mxu1 %v3712_v36  ;;  %3376 = vmatprep.subr.bf16.mxu0 %v3731_v37  ;;  %v897_v36 = vrot.slane %v888_v2, %v4105_v56  ;;  %v3746_v2 = vld [vmem:[#allocation11 + $0x148] sm:$0xff]  }
 0x1ff   :  { %2323 = vmatpush1.bf16.msra.mxu1 %v3710_v38  ;;  %3377 = vmatpush3.bf16.msra.mxu0 %v3732_v41 }
 0x200   :  { %2324 = vmatprep.subr.bf16.mxu1 %v3715_v42  ;;  %3378 = vmatprep.subr.bf16.mxu0 %v3733_v43 }
 0x203   :  { %2325 = vmatpush1.bf16.msra.mxu1 %v3713_v44  ;;  %3379 = vmatpush3.bf16.msra.mxu0 %v3734_v0 }
 0x204   :  { %2326 = vmatprep.subr.bf16.mxu1 %v3718_v45  ;;  %3380 = vmatprep.subr.bf16.mxu0 %v3735_v48 }
 0x207   :  { %2327 = vmatpush1.bf16.msra.mxu1 %v3716_v46  ;;  %3381 = vmatpush3.bf16.msra.mxu0 %v3736_v49 }
 0x208   :  { %2328 = vmatprep.subr.bf16.mxu1 %v3721_v47  ;;  %3382 = vmatprep.subr.bf16.mxu0 %v3737_v52 }
 0x20b   :  { %2329 = vmatpush1.bf16.msra.mxu1 %v3719_v50  ;;  %3383 = vmatpush3.bf16.msra.mxu0 %v3738_v57 }
 0x20c   :  { %2330 = vmatprep.subr.bf16.mxu1 %v3724_v51  ;;  %3384 = vmatprep.subr.bf16.mxu0 %v3739_v61 }
 0x20f   :  { %2331 = vmatpush1.bf16.msra.mxu1 %v3722_v58  ;;  %3385 = vmatpush3.bf16.msra.mxu0 %v3740_v62  ;;  %v3744_v62 = vld [vmem:[#allocation11 + $0x100] sm:$0xff]  }
 0x210   :  { %3392 = vmatprep.subr.bf16.mxu1 %v3741_v11  ;;  %3414 = vmatprep.subr.bf16.mxu0 %v3742_v12  ;;  %v3766_v11 = vld [vmem:[#allocation11 + $0x170] sm:$0xff]  }
 0x212   :  { %2333 = vmatmul.mubr.bf16.vlgmr.msra.gmra.mrb[16].mxu1 %v4133_v60  ;;  %v3745_v60 = vld [vmem:[#allocation11 + $0xc8] sm:$0xff]  }
 0x213   :  { %3393 = vmatpush3.bf16.msra.mxu1 %v3743_v13 }
 0x214   :  { %3394 = vmatprep.subr.bf16.mxu1 %v3745_v60 }
 0x217   :  { %3395 = vmatpush3.bf16.msra.mxu1 %v3747_v14 }
 0x218   :  { %3396 = vmatprep.subr.bf16.mxu1 %v3749_v15  ;;  %v3768_v15 = vld [vmem:[#allocation11 + $0x130] sm:$0xff]  }
 0x21b   :  { %3397 = vmatpush3.bf16.msra.mxu1 %v3751_v63 }
 0x21c   :  { %3398 = vmatprep.subr.bf16.mxu1 %v3753_v16  ;;  %v3770_v16 = vld [vmem:[#allocation11 + $0x178] sm:$0xff]  }
 0x21f   :  { %3399 = vmatpush3.bf16.msra.mxu1 %v3755_v17 }
 0x220   :  { %3400 = vmatprep.subr.bf16.mxu1 %v3757_v18  ;;  %v3772_v18 = vld [vmem:[#allocation11 + $0x138] sm:$0xff]  }
 0x223   :  { %3401 = vmatpush3.bf16.msra.mxu1 %v3759_v19  ;;  %v1728_v19 = vld [vmem:[%s4182_s6] sm:$0x7] }
 0x224   :  { %3402 = vmatprep.subr.bf16.mxu1 %v3761_v20  ;;  %v1741_v20 = vrot.slane %v1728_v19, %v4112_v59  ;;  %v1737_v59 = vrot.slane %v1728_v19, %v4105_v56 }
 0x227   :  { %3403 = vmatpush3.bf16.msra.mxu1 %v3763_v53 }
 0x228   :  { %3404 = vmatprep.subr.bf16.mxu1 %v3765_v24 }
 0x22b   :  { %3405 = vmatpush3.bf16.msra.mxu1 %v3767_v26 }
 0x22c   :  { %3406 = vmatprep.subr.bf16.mxu1 %v3769_v31 }
 0x22f   :  { %3407 = vmatpush3.bf16.msra.mxu1 %v3771_v32 }
 0x245   :  { %v3298_v3 = vpop.f32.mrb[8].mxu1 }
 0x246   :  { %v3299_v5 = vpop.f32.mrb[9].mxu1 }
 0x247   :  { %v3300_v6 = vadd.f32 %v3299_v5, %v3298_v3  ;;  %v3301_v7 = vpop.f32.mrb[10].mxu1  ;;  %v3748_v3 = vld [vmem:[#allocation11 + $0x108] sm:$0xff]   ;;  %v3752_v5 = vld [vmem:[#allocation11 + $0x110] sm:$0xff]  }
 0x248   :  { %v3302_v8 = vpop.f32.mrb[11].mxu1 }
 0x249   :  { %v1538_v9 = vadd.f32 %v3300_v6, %v901_v4  ;;  %v3303_v10 = vadd.f32 %v3302_v8, %v3301_v7  ;;  %v3754_v6 = vld [vmem:[#allocation11 + $0x158] sm:$0xff]   ;;  %v3758_v8 = vld [vmem:[#allocation11 + $0x160] sm:$0xff]  }
 0x24a   :  { %v3756_v7 = vld [vmem:[#allocation11 + $0x118] sm:$0xff]  }
 0x24b   :  { %v1541_v39 = vadd.f32 %v3303_v10, %v901_v4  ;;  %v3750_v4 = vld [vmem:[#allocation11 + $0x150] sm:$0xff]   ;;  %v3762_v10 = vld [vmem:[#allocation11 + $0x168] sm:$0xff]  }
 0x265   :  { %v3320_v21 = vpop.f32.mrb[12].mxu1 }
 0x266   :  { %v3321_v22 = vpop.f32.mrb[13].mxu1 }
 0x267   :  { %v3322_v23 = vadd.f32 %v3321_v22, %v3320_v21  ;;  %v3323_v1 = vpop.f32.mrb[14].mxu1 }
 0x268   :  { %v3324_v25 = vpop.f32.mrb[15].mxu1 }
 0x269   :  { %v1579_v27 = vadd.f32 %v3322_v23, %v1538_v9  ;;  %v3325_v28 = vadd.f32 %v3324_v25, %v3323_v1  ;;  %v3760_v9 = vld [vmem:[#allocation11 + $0x120] sm:$0xff]  }
 0x26b   :  { %v1587_v29 = vmul.f32 0.01, %v1579_v27  ;;  %v1582_v30 = vadd.f32 %v3325_v28, %v1541_v39  ;;  %v3764_v39 = vld [vmem:[#allocation11 + $0x128] sm:$0xff]  }
 0x26d   :  { %v1590_v33 = vmul.f32 0.01, %v1582_v30  ;;  %v1593_v34 = vmax.f32 %v1579_v27, %v1587_v29 }
 0x26f   :  { %v1596_v55 = vmax.f32 %v1582_v30, %v1590_v33 }
 0x271   :  { %v4150_v40 = vpack.c.bf16 %v1596_v55, %v1593_v34  ;;  %v1733_v34 = vrot.slane %v1728_v19, %v4100_v54 }
 0x285   :  { %v1494_v37 = vpop.f32.mrb[8].mxu0 }
 0x286   :  { %v3436_v38 = vadd.f32 %v1494_v37, %v893_v35  ;;  %v1496_v41 = vpop.f32.mrb[9].mxu0 }
 0x287   :  { %v3437_v42 = vadd.f32 %v1496_v41, %v897_v36  ;;  %v1498_v43 = vpop.f32.mrb[10].mxu0 }
 0x288   :  { %v1585_v44 = vmul.f32 0.01, %v3436_v38  ;;  %v3438_v0 = vadd.f32 %v1498_v43, %v893_v35  ;;  %v1500_v45 = vpop.f32.mrb[11].mxu0 }
 0x289   :  { %v1586_v46 = vmul.f32 0.01, %v3437_v42  ;;  %v3439_v47 = vadd.f32 %v1500_v45, %v897_v36 }
 0x28a   :  { %v1588_v48 = vmul.f32 0.01, %v3438_v0  ;;  %v1591_v50 = vmax.f32 %v3436_v38, %v1585_v44 }
 0x28b   :  { %v1589_v49 = vmul.f32 0.01, %v3439_v47  ;;  %v1592_v52 = vmax.f32 %v3437_v42, %v1586_v46 }
 0x28c   :  { %v1594_v51 = vmax.f32 %v3438_v0, %v1588_v48 }
 0x28d   :  { %v1595_v57 = vmax.f32 %v3439_v47, %v1589_v49 }
 0x28e   :  { %v1597_v58 = vpack.c.bf16 %v1594_v51, %v1591_v50 }
 0x28f   :  { %v1598_v61 = vpack.c.bf16 %v1595_v57, %v1592_v52 }
 0x291   :  { %2863 = vmatprep.mubr.bf16.mxu0 %v1598_v61 }
 0x292   :  { %2864 = vmatmul.mubr.bf16.vlgmr.msra.gmra.mrb[20].mxu0 %v1597_v58 }
 0x293   :  { %3415 = vmatpush3.bf16.msra.mxu0 %v3744_v62 }
 0x294   :  { %3416 = vmatprep.subr.bf16.mxu0 %v3746_v2  ;;  %v3233_v2 = vld [vmem:[%s4184_s8] ss:$0 sm:$0xff]  ;;  %s3905_s8 = scalar_lea.vmem %s2962_s21, 256 }
 0x295   :  { %p3906_p6 = scmp.ne.s32.totalorder %s2962_s21, %s3905_s8  ;;  %p3911_p8 = scmp.lt.s32.totalorder %s3905_s8, %s3905_s8 }
 0x297   :  { %3417 = vmatpush3.bf16.msra.mxu0 %v3748_v3  ;;  %p3912_p9 = por %p3911_p8, %p3910_p7 }
 0x298   :  { %3418 = vmatprep.subr.bf16.mxu0 %v3750_v4 }
 0x299   :  { %p3913_p10 = pnand %p3912_p9, %p3906_p6 }
 0x29b   :  { %3419 = vmatpush3.bf16.msra.mxu0 %v3752_v5 }
 0x29c   :  { %3420 = vmatprep.subr.bf16.mxu0 %v3754_v6 }
 0x29f   :  { %3421 = vmatpush3.bf16.msra.mxu0 %v3756_v7 }
 0x2a0   :  { %3422 = vmatprep.subr.bf16.mxu0 %v3758_v8 }
 0x2a3   :  { %3423 = vmatpush3.bf16.msra.mxu0 %v3760_v9 }
 0x2a4   :  { %3424 = vmatprep.subr.bf16.mxu0 %v3762_v10 }
 0x2a5   :  { %v3342_v12 = vpop.f32.mrb[12].mxu0 }
 0x2a6   :  { %v3343_v13 = vpop.f32.mrb[13].mxu0 }
 0x2a7   :  { %v3344_v60 = vadd.f32 %v3343_v13, %v3342_v12  ;;  %v3345_v14 = vpop.f32.mrb[14].mxu0  ;;  %3425 = vmatpush3.bf16.msra.mxu0 %v3764_v39 }
 0x2a8   :  { %v3346_v63 = vpop.f32.mrb[15].mxu0  ;;  %3426 = vmatprep.subr.bf16.mxu0 %v3766_v11 }
 0x2a9   :  { %v3347_v17 = vadd.f32 %v3346_v63, %v3345_v14  ;;  %v2378_v22 = vadd.f32 %v3344_v60, %v1741_v20 }
 0x2ab   :  { %3427 = vmatpush3.bf16.msra.mxu0 %v3768_v15  ;;  %v2381_v25 = vadd.f32 %v3347_v17, %v1741_v20 }
 0x2ac   :  { %3428 = vmatprep.subr.bf16.mxu0 %v3770_v16 }
 0x2af   :  { %3429 = vmatpush3.bf16.msra.mxu0 %v3772_v18 }
 0x2c5   :  { %v3364_v53 = vpop.f32.mrb[16].mxu0 }
 0x2c6   :  { %v3365_v21 = vpop.f32.mrb[17].mxu0 }
 0x2c7   :  { %v3366_v23 = vadd.f32 %v3365_v21, %v3364_v53  ;;  %v3367_v1 = vpop.f32.mrb[18].mxu0 }
 0x2c8   :  { %v3368_v24 = vpop.f32.mrb[19].mxu0 }
 0x2c9   :  { %v2419_v26 = vadd.f32 %v3366_v23, %v2378_v22  ;;  %v3369_v27 = vadd.f32 %v3368_v24, %v3367_v1 }
 0x2cb   :  { %v2427_v28 = vmul.f32 0.01, %v2419_v26  ;;  %v2422_v29 = vadd.f32 %v3369_v27, %v2381_v25 }
 0x2cd   :  { %v2430_v30 = vmul.f32 0.01, %v2422_v29  ;;  %v2433_v31 = vmax.f32 %v2419_v26, %v2427_v28 }
 0x2cf   :  { %v2436_v32 = vmax.f32 %v2422_v29, %v2430_v30 }
 0x2d1   :  { %v2439_v33 = vpack.c.bf16 %v2436_v32, %v2433_v31 }
 0x2d3   :  { %2945 = vmatprep.mubr.bf16.mxu0 %v2439_v33 }
 0x2e5   :  { %v2334_v55 = vpop.f32.mrb[16].mxu1 }
 0x2e6   :  { %v3440_v35 = vadd.f32 %v2334_v55, %v1733_v34  ;;  %v2336_v36 = vpop.f32.mrb[17].mxu1 }
 0x2e7   :  { %v3441_v37 = vadd.f32 %v2336_v36, %v1737_v59  ;;  %v2338_v38 = vpop.f32.mrb[18].mxu1 }
 0x2e8   :  { %v2425_v41 = vmul.f32 0.01, %v3440_v35  ;;  %v3442_v42 = vadd.f32 %v2338_v38, %v1733_v34  ;;  %v2340_v43 = vpop.f32.mrb[19].mxu1 }
 0x2e9   :  { %v2426_v44 = vmul.f32 0.01, %v3441_v37  ;;  %v3443_v0 = vadd.f32 %v2340_v43, %v1737_v59 }
 0x2ea   :  { %v2428_v45 = vmul.f32 0.01, %v3442_v42  ;;  %v2431_v47 = vmax.f32 %v3440_v35, %v2425_v41 }
 0x2eb   :  { %v2429_v46 = vmul.f32 0.01, %v3443_v0  ;;  %v2432_v49 = vmax.f32 %v3441_v37, %v2426_v44 }
 0x2ec   :  { %v2434_v48 = vmax.f32 %v3442_v42, %v2428_v45 }
 0x2ed   :  { %v2435_v50 = vmax.f32 %v3443_v0, %v2429_v46 }
 0x2ee   :  { %v2437_v51 = vpack.c.bf16 %v2434_v48, %v2431_v47 }
 0x2ef   :  { %v2438_v54 = vpack.c.bf16 %v2435_v50, %v2432_v49 }
 0x2f0   :  { %2904 = vmatprep.mubr.bf16.mxu1 %v2437_v51 }
 0x2f1   :  { %2905 = vmatmul.mubr.bf16.vlgmr.msra.gmra.mrb[20].mxu1 %v4150_v40  ;;  %2946 = vmatmul.mubr.bf16.vlgmr.msra.gmra.mrb[24].mxu0 %v2438_v54 }
 0x365   :  { %v3386_v56 = vpop.f32.mrb[20].mxu0 }
 0x366   :  { %v3387_v52 = vpop.f32.mrb[21].mxu0 }
 0x367   :  { %v3388_v57 = vadd.f32 %v3387_v52, %v3386_v56  ;;  %v3389_v58 = vpop.f32.mrb[22].mxu0 }
 0x368   :  { %v3390_v61 = vpop.f32.mrb[23].mxu0 }
 0x369   :  { %v3391_v62 = vadd.f32 %v3390_v61, %v3389_v58  ;;  %v2866_v7 = vadd.f32 %v3388_v57, %v3233_v2 }
 0x36b   :  { %v2869_v12 = vadd.f32 %v3391_v62, %v3233_v2 }
 0x3c4   :  { %v3408_v3 = vpop.f32.mrb[20].mxu1  ;;  %v3430_v4 = vpop.f32.mrb[24].mxu0 }
 0x3c5   :  { %v3409_v5 = vpop.f32.mrb[21].mxu1  ;;  %v3431_v6 = vpop.f32.mrb[25].mxu0 }
 0x3c6   :  { %v3410_v8 = vadd.f32 %v3409_v5, %v3408_v3  ;;  %v3432_v9 = vadd.f32 %v3431_v6, %v3430_v4  ;;  %v3411_v10 = vpop.f32.mrb[22].mxu1  ;;  %v3433_v40 = vpop.f32.mrb[26].mxu0 }
 0x3c7   :  { %v3412_v39 = vpop.f32.mrb[23].mxu1  ;;  %v3434_v11 = vpop.f32.mrb[27].mxu0 }
 0x3c8   :  { %v2907_v13 = vadd.f32 %v3410_v8, %v2866_v7  ;;  %v3413_v60 = vadd.f32 %v3412_v39, %v3411_v10  ;;  %v3435_v14 = vadd.f32 %v3434_v11, %v3433_v40 }
 0x3ca   :  { %v2948_v15 = vadd.f32 %v3432_v9, %v2907_v13  ;;  %v2910_v63 = vadd.f32 %v3413_v60, %v2869_v12 }
 0x3cc   :  { %2954 = vst [vmem:[#allocation13] sm:$0xff] %v2948_v15  ;;  %v2951_v16 = vadd.f32 %v3435_v14, %v2910_v63 }
 0x3ce   :  { %2955 = vst [vmem:[#allocation13 + $0x8] sm:$0xff] %v2951_v16 }
 0x3cf   :  { %3916 = shalt.err (!%p3913_p10)
}
 0x3d0   :  { %s3917_s25 = scalar_lea.hbm %s4185_s9, 256 }
 0x3d1   :  { %p3918_p11 = scmp.ne.s32.totalorder %s4185_s9, %s3917_s25  ;;  %p3921_p12 = scmp.lt.u32.totalorder %s3917_s25, %s4185_s9 }
 0x3d3   :  { %p3923_p13 = pnand %p3921_p12, %p3918_p11 }
 0x3d5   :  { %3926 = shalt.err (!%p3923_p13)
}
 0x3d6   :  { %s3951_s2 = smov 128   ;;  %s3952_s29 = smov 8  }
 0x3d7   :  { %2967 = dma.vmem_to_hbm [thread:$0]  %s2962_s21, 256, %s4185_s9, [#allocation4], %s3951_s2, %s3951_s2, %s3952_s29  }
 0x3d8   :  { %3935 = dma.done.wait [#allocation4], 256  }
 0x3d9   :  { %3936 = vsyncadd [#allocation4], 4294967040 }
 0x3da   :  { %2971 = vsyncpa [#allocation3], 1 }
 0x3db   :  { %2972 = vsyncpa [#allocation6], 1 }
 0x3dc   :  { %2973 = vsyncpa [#allocation9], 1 }
 0x3dd   :  { %2974 = vsyncpa [#allocation12], 1 }
 0x3de   :  { %2975 = vsyncpa [#allocation4], 1 }

</bundles_post_ra>
